<compile_context>
chip_gen: v7x
topology: tpu7x:2x2x1
jax: 0.10.0
libtpu: 0.0.40
codegen_flags: <defaults>
</compile_context>

<pallas_src>
import jax
import jax.numpy as jnp
from jax.experimental import pallas as pl
from jax.experimental.pallas import tpu as pltpu

_LANE = 128          # lane width / padded feature width
_POOL_TAPS = 9       # 3x3 maxpool, stride 1
_BN_EPS = 1e-5


# ----------------------------------------------------------------------------
# One-time parameter lowering (glue, outside the kernel / hot path)
# ----------------------------------------------------------------------------
def _round_up(n, m):
    return ((n + m - 1) // m) * m


def _pad2(a, rows, cols):
    return jnp.pad(a, ((0, rows - a.shape[0]), (0, cols - a.shape[1])))


def _pad1(a, n):
    return jnp.pad(a, (0, n - a.shape[0]))


def _conv_bn_dense(w, b, gamma, beta, mean, var, H, W):
    """Lower Conv2d(valid, stride 1) + eval BatchNorm on a (C_in,H,W) input to a dense map.

    Returns:
      resp:     (F_in, C_out, H_out, W_out)  -- response of each flattened-input basis vector
      bias_map: (C_out, H_out, W_out)        -- per-output-position bias (constant per channel)
    so that  bn(conv(x)).flatten() == x.flatten() @ resp.reshape(F_in, -1) + bias_map.flatten()
    """
    C_out, C_in, kh, kw = w.shape
    F_in = C_in * H * W
    basis = jnp.eye(F_in, dtype=jnp.float32).reshape(F_in, C_in, H, W)
    resp = jax.lax.conv_general_dilated(
        basis, w.astype(jnp.float32), window_strides=(1, 1), padding="VALID",
        dimension_numbers=("NCHW", "OIHW", "NCHW"))          # (F_in, C_out, H_out, W_out)
    scale = gamma / jnp.sqrt(var + _BN_EPS)                   # (C_out,)
    resp = resp * scale[None, :, None, None]
    bias = scale * (b - mean) + beta                          # (C_out,)
    H_out, W_out = H - kh + 1, W - kw + 1
    bias_map = jnp.broadcast_to(bias[:, None, None], (C_out, H_out, W_out))
    return resp, bias_map


def _conv_bn_pool_lowered(w, b, gamma, beta, mean, var, H, W, pad_to=_LANE, pool=3):
    """Fold conv+BN with the 9 maxpool taps: returns (F_in, 9*pad_to) matrix and (1, 9*pad_to) bias.

    Kernel computes relu(x @ W_cat + b_cat) and takes the max over the 9 lane-blocks, which
    equals maxpool3(relu(bn(conv(x)))) flattened (relu commutes with the 0/1 tap selection).
    Padded lanes carry zeros (relu(0)=0) and are ignored by the next layer's zero rows.
    """
    resp, bias_map = _conv_bn_dense(w, b, gamma, beta, mean, var, H, W)
    F_in, C_out, H_out, W_out = resp.shape
    Hp, Wp = H_out - pool + 1, W_out - pool + 1
    mats, vecs = [], []
    for dh in range(pool):
        for dw in range(pool):
            m = resp[:, :, dh:dh + Hp, dw:dw + Wp].reshape(F_in, C_out * Hp * Wp)
            v = bias_map[:, dh:dh + Hp, dw:dw + Wp].reshape(C_out * Hp * Wp)
            mats.append(jnp.pad(m, ((0, 0), (0, pad_to - m.shape[1]))))
            vecs.append(jnp.pad(v, (0, pad_to - v.shape[0])))
    return jnp.concatenate(mats, axis=1), jnp.concatenate(vecs)[None, :]


def build_lowered_params(p):
    """One-time lowering of the PyTorch-layout parameters into lane-dense kernel operands."""
    # f1: conv5(1->2) on 14x14 + BN + ReLU + maxpool3  -> 2*8*8 = 128 lanes per tap
    w1c, b1c = _conv_bn_pool_lowered(p["w1"], p["b1"], p["g1"], p["be1"], p["m1"], p["v1"],
                                     H=14, W=14)
    # f2: conv5(2->4) on 8x8 + BN + ReLU + maxpool3    -> 4*2*2 = 16 real lanes per tap (pad 128)
    w2c, b2c = _conv_bn_pool_lowered(p["w2"], p["b2"], p["g2"], p["be2"], p["m2"], p["v2"],
                                     H=8, W=8)
    # f3: conv2(4->8) on 2x2 + BN + ReLU               -> 8 real lanes (pad 128)
    resp3, bias3 = _conv_bn_dense(p["w3"], p["b3"], p["g3"], p["be3"], p["m3"], p["v3"],
                                  H=2, W=2)
    w3 = resp3.reshape(resp3.shape[0], -1)                     # (16, 8)
    w3p = _pad2(w3, _LANE, _LANE)
    b3p = _pad1(bias3.reshape(-1), _LANE)[None, :]
    # f4: Linear(8,4)+ReLU  (pre-transposed once; zero rows for padded lanes)
    w4p = _pad2(p["w4"].T, _LANE, _LANE)
    b4p = _pad1(p["b4"], _LANE)[None, :]
    # f5: Linear(4,1)+Sigmoid (only lane 0 of the output is real)
    w5p = _pad2(p["w5"].T, _LANE, _LANE)
    b5p = _pad1(p["b5"], _LANE)[None, :]
    return (w1c, b1c, w2c, b2c, w3p, b3p, w4p, b4p, w5p, b5p)


# ----------------------------------------------------------------------------
# Pallas kernel: whole CNN forward for a tile of `tm` samples
# ----------------------------------------------------------------------------
def _cnn_kernel(x_ref, w1_ref, b1_ref, w2_ref, b2_ref, w3_ref, b3_ref,
                w4_ref, b4_ref, w5_ref, b5_ref, o_ref):
    f32 = jnp.float32

    def conv_bn_relu_pool(x, w_ref, b_ref):
        # one wide MXU matmul (all 9 pool taps concatenated along lanes) + bias + ReLU
        h = jnp.dot(x, w_ref[...], preferred_element_type=f32) + b_ref[...]
        h = jnp.maximum(h, 0.0)
        # maxpool = max over the 9 lane-aligned 128-wide blocks (pure vreg selects)
        p = h[:, 0:_LANE]
        for k in range(1, _POOL_TAPS):
            p = jnp.maximum(p, h[:, k * _LANE:(k + 1) * _LANE])
        return p

    x = x_ref[...].astype(f32)
    p1 = conv_bn_relu_pool(x, w1_ref, b1_ref)       # (tm, 128)  == (2, 8, 8) flattened
    p2 = conv_bn_relu_pool(p1, w2_ref, b2_ref)      # (tm, 128)  16 real lanes == (4, 2, 2)
    h3 = jnp.maximum(
        jnp.dot(p2, w3_ref[...], preferred_element_type=f32) + b3_ref[...], 0.0)  # conv2+BN+ReLU
    h4 = jnp.maximum(
        jnp.dot(h3, w4_ref[...], preferred_element_type=f32) + b4_ref[...], 0.0)  # Linear+ReLU
    z = jnp.dot(h4, w5_ref[...], preferred_element_type=f32) + b5_ref[...]        # Linear
    o_ref[...] = (1.0 / (1.0 + jnp.exp(-z))).astype(o_ref.dtype)                  # Sigmoid


def cnn_forward(x_flat, lowered, *, tm=128):
    """x_flat: (N, 196) float32 -> (N, 1) float32, matching CNN.forward semantics (eval BN)."""
    N, F_in = x_flat.shape
    (w1c, b1c, w2c, b2c, w3p, b3p, w4p, b4p, w5p, b5p) = lowered

    tm = min(tm, _round_up(max(N, 1), 8))
    N_pad = _round_up(N, tm)
    if N_pad != N:
        x_flat = jnp.pad(x_flat, ((0, N_pad - N), (0, 0)))
    grid = (N_pad // tm,)

    def full(shape):
        return pl.BlockSpec(shape, lambda i: (0, 0))

    weight_elems = sum(int(a.size) for a in lowered)
    flops = 2 * N_pad * (F_in * w1c.shape[1] + _LANE * w2c.shape[1] + 3 * _LANE * _LANE)
    bytes_accessed = 4 * (N_pad * F_in + N_pad * _LANE + weight_elems)

    out = pl.pallas_call(
        _cnn_kernel,
        out_shape=jax.ShapeDtypeStruct((N_pad, _LANE), jnp.float32),
        grid_spec=pltpu.PrefetchScalarGridSpec(
            num_scalar_prefetch=0,
            grid=grid,
            in_specs=[
                pl.BlockSpec((tm, F_in), lambda i: (i, 0)),   # batch-tiled activations
                full(w1c.shape), full(b1c.shape),
                full(w2c.shape), full(b2c.shape),
                full(w3p.shape), full(b3p.shape),
                full(w4p.shape), full(b4p.shape),
                full(w5p.shape), full(b5p.shape),
            ],
            out_specs=pl.BlockSpec((tm, _LANE), lambda i: (i, 0)),  # lane-dense output block
        ),
        compiler_params=pltpu.CompilerParams(
            dimension_semantics=("parallel",),   # batch axis -> both TCs on v7x
        ),
        cost_estimate=pl.CostEstimate(
            flops=flops,
            transcendentals=N_pad * _LANE,
            bytes_accessed=bytes_accessed,
        ),
    )(x_flat, w1c, b1c, w2c, b2c, w3p, b3p, w4p, b4p, w5p, b5p)

    return out[:N, :1]


def cnn_apply(x, lowered):
    """Mirror CNN.forward's reshape logic: (S,196) or (B,S,196) -> (B*S, 1) predictions."""
    if x.ndim == 2:
        x = x[None, ...]
    B, S, L = x.shape
    return cnn_forward(x.reshape(B * S, L).astype(jnp.float32), lowered)


# ----------------------------------------------------------------------------
# Pure-JAX reference (eval-mode BN) for correctness checking
# ----------------------------------------------------------------------------
def cnn_reference(x, p):
    if x.ndim == 2:
        x = x[None, ...]
    B, S, L = x.shape
    y = x.reshape(B * S, 1, 14, 14).astype(jnp.float32)

    def conv_bn_relu(y, w, b, g, beta, m, v):
        y = jax.lax.conv_general_dilated(y, w, (1, 1), "VALID",
                                         dimension_numbers=("NCHW", "OIHW", "NCHW"))
        y = y + b[None, :, None, None]
        y = g[None, :, None, None] * (y - m[None, :, None, None]) \
            / jnp.sqrt(v[None, :, None, None] + _BN_EPS) + beta[None, :, None, None]
        return jnp.maximum(y, 0.0)

    def maxpool3(y):
        return jax.lax.reduce_window(y, -jnp.inf, jax.lax.max,
                                     (1, 1, 3, 3), (1, 1, 1, 1), "VALID")

    y = maxpool3(conv_bn_relu(y, p["w1"], p["b1"], p["g1"], p["be1"], p["m1"], p["v1"]))
    y = maxpool3(conv_bn_relu(y, p["w2"], p["b2"], p["g2"], p["be2"], p["m2"], p["v2"]))
    y = conv_bn_relu(y, p["w3"], p["b3"], p["g3"], p["be3"], p["m3"], p["v3"])
    y = y.reshape(y.shape[0], -1)
    y = jnp.maximum(y @ p["w4"].T + p["b4"], 0.0)
    y = 1.0 / (1.0 + jnp.exp(-(y @ p["w5"].T + p["b5"])))
    return y


if __name__ == "__main__":
    key = jax.random.PRNGKey(0)
    ks = jax.random.split(key, 25)

    def u(k, shape, lo, hi):
        return jax.random.uniform(k, shape, jnp.float32, lo, hi)

    params = {
        # f1: Conv2d(1,2,5) + BatchNorm2d(2)
        "w1": u(ks[0], (2, 1, 5, 5), -0.2, 0.2), "b1": u(ks[1], (2,), -0.2, 0.2),
        "g1": u(ks[2], (2,), 0.5, 1.5), "be1": u(ks[3], (2,), -0.1, 0.1),
        "m1": u(ks[4], (2,), -0.1, 0.1), "v1": u(ks[5], (2,), 0.5, 1.5),
        # f2: Conv2d(2,4,5) + BatchNorm2d(4)
        "w2": u(ks[6], (4, 2, 5, 5), -0.14, 0.14), "b2": u(ks[7], (4,), -0.14, 0.14),
        "g2": u(ks[8], (4,), 0.5, 1.5), "be2": u(ks[9], (4,), -0.1, 0.1),
        "m2": u(ks[10], (4,), -0.1, 0.1), "v2": u(ks[11], (4,), 0.5, 1.5),
        # f3: Conv2d(4,8,2) + BatchNorm2d(8)
        "w3": u(ks[12], (8, 4, 2, 2), -0.25, 0.25), "b3": u(ks[13], (8,), -0.25, 0.25),
        "g3": u(ks[14], (8,), 0.5, 1.5), "be3": u(ks[15], (8,), -0.1, 0.1),
        "m3": u(ks[16], (8,), -0.1, 0.1), "v3": u(ks[17], (8,), 0.5, 1.5),
        # f4: Linear(8,4)   f5: Linear(4,1)
        "w4": u(ks[18], (4, 8), -0.35, 0.35), "b4": u(ks[19], (4,), -0.35, 0.35),
        "w5": u(ks[20], (1, 4), -0.5, 0.5), "b5": u(ks[21], (1,), -0.5, 0.5),
    }

    # Small input consistent with the module: (B, S, 14*14) -> N = B*S = 16 samples of 14x14.
    B, S, L = 2, 8, 196
    x = jax.random.normal(ks[22], (B, S, L), dtype=jnp.float32)

    lowered = build_lowered_params(params)     # one-time lowering (no per-call transposes)
    y = cnn_apply(x, lowered)
    jax.block_until_ready(y)

    y_ref = cnn_reference(x, params)
    assert y.shape == (B * S, 1)
    assert jnp.allclose(y, y_ref, atol=2e-5, rtol=1e-4), float(jnp.max(jnp.abs(y - y_ref)))

    print("KERNEL_OK")
</pallas_src>

<mosaic_0001>
module attributes {stable_mosaic.version = 11 : i64} {
  func.func @_cnn_kernel(%arg0: i32, %arg1: memref<16x196xf32, #tpu.memory_space<vmem>>, %arg2: memref<196x1152xf32, #tpu.memory_space<vmem>>, %arg3: memref<1x1152xf32, #tpu.memory_space<vmem>>, %arg4: memref<128x1152xf32, #tpu.memory_space<vmem>>, %arg5: memref<1x1152xf32, #tpu.memory_space<vmem>>, %arg6: memref<128x128xf32, #tpu.memory_space<vmem>>, %arg7: memref<1x128xf32, #tpu.memory_space<vmem>>, %arg8: memref<128x128xf32, #tpu.memory_space<vmem>>, %arg9: memref<1x128xf32, #tpu.memory_space<vmem>>, %arg10: memref<128x128xf32, #tpu.memory_space<vmem>>, %arg11: memref<1x128xf32, #tpu.memory_space<vmem>>, %arg12: memref<16x128xf32, #tpu.memory_space<vmem>>) attributes {dimension_semantics = [#tpu.dimension_semantics<parallel>], iteration_bounds = array<i64: 1>, scalar_prefetch = 0 : i64, scratch_operands = 0 : i64, tpu.core_type = #tpu.core_type<tc>, window_params = [{transform_indices = @transform_0, window_bounds = array<i64: 16, 196>}, {pipeline_mode = #tpu.pipeline_mode<synchronous>, transform_indices = @transform_1, window_bounds = array<i64: 196, 1152>}, {pipeline_mode = #tpu.pipeline_mode<synchronous>, transform_indices = @transform_2, window_bounds = array<i64: 1, 1152>}, {pipeline_mode = #tpu.pipeline_mode<synchronous>, transform_indices = @transform_3, window_bounds = array<i64: 128, 1152>}, {pipeline_mode = #tpu.pipeline_mode<synchronous>, transform_indices = @transform_4, window_bounds = array<i64: 1, 1152>}, {pipeline_mode = #tpu.pipeline_mode<synchronous>, transform_indices = @transform_5, window_bounds = array<i64: 128, 128>}, {pipeline_mode = #tpu.pipeline_mode<synchronous>, transform_indices = @transform_6, window_bounds = array<i64: 1, 128>}, {pipeline_mode = #tpu.pipeline_mode<synchronous>, transform_indices = @transform_7, window_bounds = array<i64: 128, 128>}, {pipeline_mode = #tpu.pipeline_mode<synchronous>, transform_indices = @transform_8, window_bounds = array<i64: 1, 128>}, {pipeline_mode = #tpu.pipeline_mode<synchronous>, transform_indices = @transform_9, window_bounds = array<i64: 128, 128>}, {pipeline_mode = #tpu.pipeline_mode<synchronous>, transform_indices = @transform_10, window_bounds = array<i64: 1, 128>}, {transform_indices = @transform_11, window_bounds = array<i64: 16, 128>}]} {
    %c0 = arith.constant 0 : index
    %c0_0 = arith.constant 0 : index
    %0 = vector.load %arg1[%c0, %c0_0] : memref<16x196xf32, #tpu.memory_space<vmem>>, vector<16x196xf32>
    %c0_1 = arith.constant 0 : index
    %c0_2 = arith.constant 0 : index
    %1 = vector.load %arg2[%c0_1, %c0_2] : memref<196x1152xf32, #tpu.memory_space<vmem>>, vector<196x1152xf32>
    %cst = arith.constant dense<0.000000e+00> : vector<16x1152xf32>
    %2 = tpu.matmul %0, %1, %cst {dimension_numbers = #tpu.dot_dimension_numbers<[1], [0], [0], [1], [0, 0, 1, 1], [], []>} : vector<16x196xf32>, vector<196x1152xf32>, vector<16x1152xf32> -> vector<16x1152xf32>
    %c0_3 = arith.constant 0 : index
    %c0_4 = arith.constant 0 : index
    %3 = vector.load %arg3[%c0_3, %c0_4] : memref<1x1152xf32, #tpu.memory_space<vmem>>, vector<1x1152xf32>
    %4 = vector.broadcast %3 : vector<1x1152xf32> to vector<16x1152xf32>
    %5 = arith.addf %2, %4 : vector<16x1152xf32>
    %cst_5 = arith.constant 0.000000e+00 : f32
    %6 = vector.broadcast %cst_5 : f32 to vector<16x1152xf32>
    %7 = arith.maximumf %5, %6 : vector<16x1152xf32>
    %8 = vector.extract_strided_slice %7 {offsets = [0, 0], sizes = [16, 128], strides = [1, 1]} : vector<16x1152xf32> to vector<16x128xf32>
    %9 = vector.extract_strided_slice %7 {offsets = [0, 128], sizes = [16, 128], strides = [1, 1]} : vector<16x1152xf32> to vector<16x128xf32>
    %10 = arith.maximumf %8, %9 : vector<16x128xf32>
    %11 = vector.extract_strided_slice %7 {offsets = [0, 256], sizes = [16, 128], strides = [1, 1]} : vector<16x1152xf32> to vector<16x128xf32>
    %12 = arith.maximumf %10, %11 : vector<16x128xf32>
    %13 = vector.extract_strided_slice %7 {offsets = [0, 384], sizes = [16, 128], strides = [1, 1]} : vector<16x1152xf32> to vector<16x128xf32>
    %14 = arith.maximumf %12, %13 : vector<16x128xf32>
    %15 = vector.extract_strided_slice %7 {offsets = [0, 512], sizes = [16, 128], strides = [1, 1]} : vector<16x1152xf32> to vector<16x128xf32>
    %16 = arith.maximumf %14, %15 : vector<16x128xf32>
    %17 = vector.extract_strided_slice %7 {offsets = [0, 640], sizes = [16, 128], strides = [1, 1]} : vector<16x1152xf32> to vector<16x128xf32>
    %18 = arith.maximumf %16, %17 : vector<16x128xf32>
    %19 = vector.extract_strided_slice %7 {offsets = [0, 768], sizes = [16, 128], strides = [1, 1]} : vector<16x1152xf32> to vector<16x128xf32>
    %20 = arith.maximumf %18, %19 : vector<16x128xf32>
    %21 = vector.extract_strided_slice %7 {offsets = [0, 896], sizes = [16, 128], strides = [1, 1]} : vector<16x1152xf32> to vector<16x128xf32>
    %22 = arith.maximumf %20, %21 : vector<16x128xf32>
    %23 = vector.extract_strided_slice %7 {offsets = [0, 1024], sizes = [16, 128], strides = [1, 1]} : vector<16x1152xf32> to vector<16x128xf32>
    %24 = arith.maximumf %22, %23 : vector<16x128xf32>
    %c0_6 = arith.constant 0 : index
    %c0_7 = arith.constant 0 : index
    %25 = vector.load %arg4[%c0_6, %c0_7] : memref<128x1152xf32, #tpu.memory_space<vmem>>, vector<128x1152xf32>
    %cst_8 = arith.constant dense<0.000000e+00> : vector<16x1152xf32>
    %26 = tpu.matmul %24, %25, %cst_8 {dimension_numbers = #tpu.dot_dimension_numbers<[1], [0], [0], [1], [0, 0, 1, 1], [], []>} : vector<16x128xf32>, vector<128x1152xf32>, vector<16x1152xf32> -> vector<16x1152xf32>
    %c0_9 = arith.constant 0 : index
    %c0_10 = arith.constant 0 : index
    %27 = vector.load %arg5[%c0_9, %c0_10] : memref<1x1152xf32, #tpu.memory_space<vmem>>, vector<1x1152xf32>
    %28 = vector.broadcast %27 : vector<1x1152xf32> to vector<16x1152xf32>
    %29 = arith.addf %26, %28 : vector<16x1152xf32>
    %cst_11 = arith.constant 0.000000e+00 : f32
    %30 = vector.broadcast %cst_11 : f32 to vector<16x1152xf32>
    %31 = arith.maximumf %29, %30 : vector<16x1152xf32>
    %32 = vector.extract_strided_slice %31 {offsets = [0, 0], sizes = [16, 128], strides = [1, 1]} : vector<16x1152xf32> to vector<16x128xf32>
    %33 = vector.extract_strided_slice %31 {offsets = [0, 128], sizes = [16, 128], strides = [1, 1]} : vector<16x1152xf32> to vector<16x128xf32>
    %34 = arith.maximumf %32, %33 : vector<16x128xf32>
    %35 = vector.extract_strided_slice %31 {offsets = [0, 256], sizes = [16, 128], strides = [1, 1]} : vector<16x1152xf32> to vector<16x128xf32>
    %36 = arith.maximumf %34, %35 : vector<16x128xf32>
    %37 = vector.extract_strided_slice %31 {offsets = [0, 384], sizes = [16, 128], strides = [1, 1]} : vector<16x1152xf32> to vector<16x128xf32>
    %38 = arith.maximumf %36, %37 : vector<16x128xf32>
    %39 = vector.extract_strided_slice %31 {offsets = [0, 512], sizes = [16, 128], strides = [1, 1]} : vector<16x1152xf32> to vector<16x128xf32>
    %40 = arith.maximumf %38, %39 : vector<16x128xf32>
    %41 = vector.extract_strided_slice %31 {offsets = [0, 640], sizes = [16, 128], strides = [1, 1]} : vector<16x1152xf32> to vector<16x128xf32>
    %42 = arith.maximumf %40, %41 : vector<16x128xf32>
    %43 = vector.extract_strided_slice %31 {offsets = [0, 768], sizes = [16, 128], strides = [1, 1]} : vector<16x1152xf32> to vector<16x128xf32>
    %44 = arith.maximumf %42, %43 : vector<16x128xf32>
    %45 = vector.extract_strided_slice %31 {offsets = [0, 896], sizes = [16, 128], strides = [1, 1]} : vector<16x1152xf32> to vector<16x128xf32>
    %46 = arith.maximumf %44, %45 : vector<16x128xf32>
    %47 = vector.extract_strided_slice %31 {offsets = [0, 1024], sizes = [16, 128], strides = [1, 1]} : vector<16x1152xf32> to vector<16x128xf32>
    %48 = arith.maximumf %46, %47 : vector<16x128xf32>
    %c0_12 = arith.constant 0 : index
    %c0_13 = arith.constant 0 : index
    %49 = vector.load %arg6[%c0_12, %c0_13] : memref<128x128xf32, #tpu.memory_space<vmem>>, vector<128x128xf32>
    %cst_14 = arith.constant dense<0.000000e+00> : vector<16x128xf32>
    %50 = tpu.matmul %48, %49, %cst_14 {dimension_numbers = #tpu.dot_dimension_numbers<[1], [0], [0], [1], [0, 0, 1, 1], [], []>} : vector<16x128xf32>, vector<128x128xf32>, vector<16x128xf32> -> vector<16x128xf32>
    %c0_15 = arith.constant 0 : index
    %c0_16 = arith.constant 0 : index
    %51 = vector.load %arg7[%c0_15, %c0_16] : memref<1x128xf32, #tpu.memory_space<vmem>>, vector<1x128xf32>
    %52 = vector.broadcast %51 : vector<1x128xf32> to vector<16x128xf32>
    %53 = arith.addf %50, %52 : vector<16x128xf32>
    %cst_17 = arith.constant 0.000000e+00 : f32
    %54 = vector.broadcast %cst_17 : f32 to vector<16x128xf32>
    %55 = arith.maximumf %53, %54 : vector<16x128xf32>
    %c0_18 = arith.constant 0 : index
    %c0_19 = arith.constant 0 : index
    %56 = vector.load %arg8[%c0_18, %c0_19] : memref<128x128xf32, #tpu.memory_space<vmem>>, vector<128x128xf32>
    %cst_20 = arith.constant dense<0.000000e+00> : vector<16x128xf32>
    %57 = tpu.matmul %55, %56, %cst_20 {dimension_numbers = #tpu.dot_dimension_numbers<[1], [0], [0], [1], [0, 0, 1, 1], [], []>} : vector<16x128xf32>, vector<128x128xf32>, vector<16x128xf32> -> vector<16x128xf32>
    %c0_21 = arith.constant 0 : index
    %c0_22 = arith.constant 0 : index
    %58 = vector.load %arg9[%c0_21, %c0_22] : memref<1x128xf32, #tpu.memory_space<vmem>>, vector<1x128xf32>
    %59 = vector.broadcast %58 : vector<1x128xf32> to vector<16x128xf32>
    %60 = arith.addf %57, %59 : vector<16x128xf32>
    %cst_23 = arith.constant 0.000000e+00 : f32
    %61 = vector.broadcast %cst_23 : f32 to vector<16x128xf32>
    %62 = arith.maximumf %60, %61 : vector<16x128xf32>
    %c0_24 = arith.constant 0 : index
    %c0_25 = arith.constant 0 : index
    %63 = vector.load %arg10[%c0_24, %c0_25] : memref<128x128xf32, #tpu.memory_space<vmem>>, vector<128x128xf32>
    %cst_26 = arith.constant dense<0.000000e+00> : vector<16x128xf32>
    %64 = tpu.matmul %62, %63, %cst_26 {dimension_numbers = #tpu.dot_dimension_numbers<[1], [0], [0], [1], [0, 0, 1, 1], [], []>} : vector<16x128xf32>, vector<128x128xf32>, vector<16x128xf32> -> vector<16x128xf32>
    %c0_27 = arith.constant 0 : index
    %c0_28 = arith.constant 0 : index
    %65 = vector.load %arg11[%c0_27, %c0_28] : memref<1x128xf32, #tpu.memory_space<vmem>>, vector<1x128xf32>
    %66 = vector.broadcast %65 : vector<1x128xf32> to vector<16x128xf32>
    %67 = arith.addf %64, %66 : vector<16x128xf32>
    %cst_29 = arith.constant 0.000000e+00 : f32
    %68 = vector.broadcast %cst_29 : f32 to vector<16x128xf32>
    %69 = arith.subf %68, %67 : vector<16x128xf32>
    %70 = math.exp %69 : vector<16x128xf32>
    %cst_30 = arith.constant 1.000000e+00 : f32
    %71 = vector.broadcast %cst_30 : f32 to vector<16x128xf32>
    %72 = arith.addf %71, %70 : vector<16x128xf32>
    %cst_31 = arith.constant 1.000000e+00 : f32
    %73 = vector.broadcast %cst_31 : f32 to vector<16x128xf32>
    %74 = arith.divf %73, %72 : vector<16x128xf32>
    %c0_32 = arith.constant 0 : index
    %c0_33 = arith.constant 0 : index
    %75 = vector.load %arg12[%c0_32, %c0_33] : memref<16x128xf32, #tpu.memory_space<vmem>>, vector<16x128xf32>
    tpu.vector_store %arg12[%c0_32, %c0_33], %74 {strides = array<i32>} : memref<16x128xf32, #tpu.memory_space<vmem>>, vector<16x128xf32>,
    return
  }
  func.func @transform_0(%arg0: i32) -> (i32, i32) {
    %c0_i32 = arith.constant 0 : i32
    %c0_i32_0 = arith.constant 0 : i32
    return %arg0, %c0_i32 : i32, i32
  }
  func.func @transform_1(%arg0: i32) -> (i32, i32) {
    %c0_i32 = arith.constant 0 : i32
    %c0_i32_0 = arith.constant 0 : i32
    %c0_i32_1 = arith.constant 0 : i32
    return %c0_i32, %c0_i32_0 : i32, i32
  }
  func.func @transform_2(%arg0: i32) -> (i32, i32) {
    %c0_i32 = arith.constant 0 : i32
    %c0_i32_0 = arith.constant 0 : i32
    %c0_i32_1 = arith.constant 0 : i32
    return %c0_i32, %c0_i32_0 : i32, i32
  }
  func.func @transform_3(%arg0: i32) -> (i32, i32) {
    %c0_i32 = arith.constant 0 : i32
    %c0_i32_0 = arith.constant 0 : i32
    %c0_i32_1 = arith.constant 0 : i32
    return %c0_i32, %c0_i32_0 : i32, i32
  }
  func.func @transform_4(%arg0: i32) -> (i32, i32) {
    %c0_i32 = arith.constant 0 : i32
    %c0_i32_0 = arith.constant 0 : i32
    %c0_i32_1 = arith.constant 0 : i32
    return %c0_i32, %c0_i32_0 : i32, i32
  }
  func.func @transform_5(%arg0: i32) -> (i32, i32) {
    %c0_i32 = arith.constant 0 : i32
    %c0_i32_0 = arith.constant 0 : i32
    %c0_i32_1 = arith.constant 0 : i32
    return %c0_i32, %c0_i32_0 : i32, i32
  }
  func.func @transform_6(%arg0: i32) -> (i32, i32) {
    %c0_i32 = arith.constant 0 : i32
    %c0_i32_0 = arith.constant 0 : i32
    %c0_i32_1 = arith.constant 0 : i32
    return %c0_i32, %c0_i32_0 : i32, i32
  }
  func.func @transform_7(%arg0: i32) -> (i32, i32) {
    %c0_i32 = arith.constant 0 : i32
    %c0_i32_0 = arith.constant 0 : i32
    %c0_i32_1 = arith.constant 0 : i32
    return %c0_i32, %c0_i32_0 : i32, i32
  }
  func.func @transform_8(%arg0: i32) -> (i32, i32) {
    %c0_i32 = arith.constant 0 : i32
    %c0_i32_0 = arith.constant 0 : i32
    %c0_i32_1 = arith.constant 0 : i32
    return %c0_i32, %c0_i32_0 : i32, i32
  }
  func.func @transform_9(%arg0: i32) -> (i32, i32) {
    %c0_i32 = arith.constant 0 : i32
    %c0_i32_0 = arith.constant 0 : i32
    %c0_i32_1 = arith.constant 0 : i32
    return %c0_i32, %c0_i32_0 : i32, i32
  }
  func.func @transform_10(%arg0: i32) -> (i32, i32) {
    %c0_i32 = arith.constant 0 : i32
    %c0_i32_0 = arith.constant 0 : i32
    %c0_i32_1 = arith.constant 0 : i32
    return %c0_i32, %c0_i32_0 : i32, i32
  }
  func.func @transform_11(%arg0: i32) -> (i32, i32) {
    %c0_i32 = arith.constant 0 : i32
    %c0_i32_0 = arith.constant 0 : i32
    return %arg0, %c0_i32 : i32, i32
  }
}

</mosaic_0001>

<bundles_post_ra>
// kernel: tpu_custom_call.1
= control target key start
LH: loop header
LB: loop body
LE: loop exit
PB: predicated region body
PF: predicated region fallthrough
CT: control target
= control target key end

     0   :  { %16 = vsyncpa [#allocation3], 0  ;;  %s3075_s0 = inlined_call_operand.hbm [shape: f32[16,196], index: 0, kind: input, shape index: {}]   ;;  %s3076_s1 = inlined_call_operand.hbm [shape: f32[196,1152], index: 1, kind: input, shape index: {}]   ;;  %s3077_s2 = inlined_call_operand.hbm [shape: f32[1,1152], index: 2, kind: input, shape index: {}]   ;;  %s3078_s3 = inlined_call_operand.hbm [shape: f32[128,1152], index: 3, kind: input, shape index: {}]   ;;  %s3079_s4 = inlined_call_operand.vmem [shape: f32[1,1152], index: 4, kind: input, shape index: {}]   ;;  %s3080_s5 = inlined_call_operand.hbm [shape: f32[128,128], index: 5, kind: input, shape index: {}]   ;;  %s3081_s6 = inlined_call_operand.vmem [shape: f32[1,128], index: 6, kind: input, shape index: {}]   ;;  %s3082_s7 = inlined_call_operand.hbm [shape: f32[128,128], index: 7, kind: input, shape index: {}]   ;;  %s3083_s8 = inlined_call_operand.vmem [shape: f32[1,128], index: 8, kind: input, shape index: {}]   ;;  %s3084_s9 = inlined_call_operand.hbm [shape: f32[128,128], index: 9, kind: input, shape index: {}]   ;;  %s3085_s10 = inlined_call_operand.vmem [shape: f32[1,128], index: 10, kind: input, shape index: {}]   ;;  %s3086_s11 = inlined_call_operand.hbm [shape: f32[16,128], index: 11, kind: output, shape index: {}]  }
   0x1   :  { %17 = vsyncpa [#allocation6], 0 }
   0x2   :  { %18 = vsyncpa [#allocation9], 0 }
   0x3   :  { %19 = vsyncpa [#allocation12], 0 }
   0x4   :  { %20 = vsyncpa [#allocation4], 0  ;;  %s2734_s17 = smov [#allocation5]   ;;  %s2548_s21 = scalar_lea.hbm %s3076_s1, 28800 }
   0x5   :  { %s38_s18 = sshll.u32 %s2734_s17, 4  ;;  %p2549_p0 = scmp.ne.s32.totalorder %s3076_s1, %s2548_s21  ;;  %s39_s18 = int_to_ptr.vmem [resolvable:$true] %s38_s18 }
   0x6   :  { %p2552_p1 = scmp.lt.u32.totalorder %s2548_s21, %s3076_s1 }
   0x8   :  { %p2554_p2 = pnand %p2552_p1, %p2549_p0 }
   0xa   :  { %2557 = shalt.err (!%p2554_p2)
}
   0xb   :  { %s2558_s26 = scalar_lea.vmem %s39_s18, 28800  ;;  %p2563_p4 = scmp.lt.s32.totalorder %s39_s18, %s39_s18 }
   0xc   :  { %p2559_p3 = scmp.ne.s32.totalorder %s39_s18, %s2558_s26  ;;  %p2564_p5 = scmp.lt.s32.totalorder %s2558_s26, %s2558_s26 }
   0xe   :  { %p2565_p6 = por %p2564_p5, %p2563_p4 }
  0x10   :  { %p2566_p7 = pnand %p2565_p6, %p2559_p3 }
  0x12   :  { %2569 = shalt.err (!%p2566_p7)
}
  0x13   :  { %s2735_s27 = smov 1152   ;;  %s2736_s28 = smov 72  }
  0x14   :  { %44 = dma.hbm_to_vmem [thread:$0]  %s3076_s1, 28800, %s39_s18, [#allocation6], %s2735_s27, %s2735_s27, %s2736_s28  }
  0x15   :  { %s2737_s12 = smov [#allocation8]   ;;  %s2570_s16 = scalar_lea.hbm %s3078_s3, 18432 }
  0x16   :  { %s60_s13 = sshll.u32 %s2737_s12, 4  ;;  %p2571_p8 = scmp.ne.s32.totalorder %s3078_s3, %s2570_s16  ;;  %s61_s13 = int_to_ptr.vmem [resolvable:$true] %s60_s13 }
  0x17   :  { %p2574_p9 = scmp.lt.u32.totalorder %s2570_s16, %s3078_s3 }
  0x19   :  { %p2576_p10 = pnand %p2574_p9, %p2571_p8 }
  0x1b   :  { %2579 = shalt.err (!%p2576_p10)
}
  0x1c   :  { %s2580_s22 = scalar_lea.vmem %s61_s13, 18432  ;;  %p2585_p12 = scmp.lt.s32.totalorder %s61_s13, %s61_s13 }
  0x1d   :  { %p2581_p11 = scmp.ne.s32.totalorder %s61_s13, %s2580_s22  ;;  %p2586_p13 = scmp.lt.s32.totalorder %s2580_s22, %s2580_s22 }
  0x1f   :  { %p2587_p0 = por %p2586_p13, %p2585_p12 }
  0x21   :  { %p2588_p1 = pnand %p2587_p0, %p2581_p11 }
  0x23   :  { %2591 = shalt.err (!%p2588_p1)
}
  0x24   :  { %66 = dma.hbm_to_vmem [thread:$0]  %s3078_s3, 18432, %s61_s13, [#allocation9], %s2735_s27, %s2735_s27, %s2736_s28  }
  0x25   :  { %s2738_s23 = smov [#allocation11]   ;;  %s2739_s25 = smov [#allocation2]  }
  0x26   :  { %s88_s24 = sshll.u32 %s2738_s23, 4  ;;  %s26_s26 = sshll.u32 %s2739_s25, 4  ;;  %s89_s24 = int_to_ptr.vmem [resolvable:$true] %s88_s24  ;;  %s2834_s26 = int_to_ptr.vmem [resolvable:$true] %s26_s26 }
  0x27   :  { %s2592_s12 = scalar_lea.hbm %s3082_s7, 2048 }
  0x28   :  { %p2593_p2 = scmp.ne.s32.totalorder %s3082_s7, %s2592_s12  ;;  %p2596_p3 = scmp.lt.u32.totalorder %s2592_s12, %s3082_s7 }
  0x2a   :  { %p2598_p4 = pnand %p2596_p3, %p2593_p2 }
  0x2c   :  { %2601 = shalt.err (!%p2598_p4)
}
  0x2d   :  { %s2602_s3 = scalar_lea.vmem %s89_s24, 2048  ;;  %p2607_p6 = scmp.lt.s32.totalorder %s89_s24, %s89_s24 }
  0x2e   :  { %p2603_p5 = scmp.ne.s32.totalorder %s89_s24, %s2602_s3  ;;  %p2608_p7 = scmp.lt.s32.totalorder %s2602_s3, %s2602_s3 }
  0x30   :  { %p2609_p8 = por %p2608_p7, %p2607_p6 }
  0x32   :  { %p2610_p9 = pnand %p2609_p8, %p2603_p5 }
  0x34   :  { %2613 = shalt.err (!%p2610_p9)
}
  0x35   :  { %s2740_s27 = smov 128   ;;  %s2741_s28 = smov 8  }
  0x36   :  { %94 = dma.hbm_to_vmem [thread:$0]  %s3082_s7, 2048, %s89_s24, [#allocation12], %s2740_s27, %s2740_s27, %s2741_s28  }
  0x37   :  { %s2614_s22 = scalar_lea.hbm %s3075_s0, 512 }
  0x38   :  { %p2615_p10 = scmp.ne.s32.totalorder %s3075_s0, %s2614_s22  ;;  %p2618_p11 = scmp.lt.u32.totalorder %s2614_s22, %s3075_s0 }
  0x3a   :  { %p2620_p12 = pnand %p2618_p11, %p2615_p10 }
  0x3c   :  { %2623 = shalt.err (!%p2620_p12)
}
  0x3d   :  { %s2624_s29 = scalar_lea.vmem %s2834_s26, 512  ;;  %p2629_p0 = scmp.lt.s32.totalorder %s2834_s26, %s2834_s26 }
  0x3e   :  { %p2625_p13 = scmp.ne.s32.totalorder %s2834_s26, %s2624_s29  ;;  %p2630_p1 = scmp.lt.s32.totalorder %s2624_s29, %s2624_s29 }
  0x40   :  { %p2631_p2 = por %p2630_p1, %p2629_p0 }
  0x42   :  { %p2632_p3 = pnand %p2631_p2, %p2625_p13 }
  0x44   :  { %2635 = shalt.err (!%p2632_p3)
}
  0x45   :  { %s2742_s7 = smov 256   ;;  %s2743_s24 = smov 16  }
  0x46   :  { %32 = dma.hbm_to_vmem [thread:$0]  %s3075_s0, 512, %s2834_s26, [#allocation3], %s2742_s7, %s2742_s7, %s2743_s24  }
  0x47   :  { %s2744_s14 = smov [#allocation7]   ;;  %s2745_s16 = smov [#allocation10]  }
  0x48   :  { %s51_s15 = sshll.u32 %s2744_s14, 4  ;;  %s74_s17 = sshll.u32 %s2745_s16, 4  ;;  %s52_s15 = int_to_ptr.vmem [resolvable:$true] %s51_s15  ;;  %s2868_s17 = int_to_ptr.vmem [resolvable:$true] %s74_s17 }
  0x49   :  { %s2636_s19 = scalar_lea.hbm %s3077_s2, 144 }
  0x4a   :  { %p2637_p4 = scmp.ne.s32.totalorder %s3077_s2, %s2636_s19  ;;  %p2640_p5 = scmp.lt.u32.totalorder %s2636_s19, %s3077_s2 }
  0x4c   :  { %p2642_p6 = pnand %p2640_p5, %p2637_p4 }
  0x4e   :  { %2645 = shalt.err (!%p2642_p6)
}
  0x4f   :  { %s2646_s0 = scalar_lea.vmem %s52_s15, 144  ;;  %s2650_s26 = scalar_lea.vmem %s52_s15, 160 }
  0x50   :  { %p2647_p7 = scmp.ne.s32.totalorder %s52_s15, %s2646_s0  ;;  %p2651_p8 = scmp.lt.s32.totalorder %s52_s15, %s52_s15 }
  0x51   :  { %p2652_p9 = scmp.lt.s32.totalorder %s2650_s26, %s2646_s0 }
  0x53   :  { %p2653_p10 = por %p2652_p9, %p2651_p8 }
  0x55   :  { %p2654_p11 = pnand %p2653_p10, %p2647_p7 }
  0x57   :  { %2657 = shalt.err (!%p2654_p11)
}
  0x58   :  { %54 = dma.hbm_to_vmem [thread:$0]  %s3077_s2, 144, %s52_s15, [#allocation6]  }
  0x59   :  { %s2658_s7 = scalar_lea.hbm %s3080_s5, 2048 }
  0x5a   :  { %p2659_p12 = scmp.ne.s32.totalorder %s3080_s5, %s2658_s7  ;;  %p2662_p13 = scmp.lt.u32.totalorder %s2658_s7, %s3080_s5 }
  0x5c   :  { %p2664_p0 = pnand %p2662_p13, %p2659_p12 }
  0x5e   :  { %2667 = shalt.err (!%p2664_p0)
}
  0x5f   :  { %s2668_s16 = scalar_lea.vmem %s2868_s17, 2048  ;;  %p2673_p2 = scmp.lt.s32.totalorder %s2868_s17, %s2868_s17 }
  0x60   :  { %p2669_p1 = scmp.ne.s32.totalorder %s2868_s17, %s2668_s16  ;;  %p2674_p3 = scmp.lt.s32.totalorder %s2668_s16, %s2668_s16 }
  0x62   :  { %p2675_p4 = por %p2674_p3, %p2673_p2 }
  0x64   :  { %p2676_p5 = pnand %p2675_p4, %p2669_p1 }
  0x66   :  { %2679 = shalt.err (!%p2676_p5)
}
  0x67   :  { %80 = dma.hbm_to_vmem [thread:$0]  %s3080_s5, 2048, %s2868_s17, [#allocation9], %s2740_s27, %s2740_s27, %s2741_s28  }
  0x68   :  { %s2746_s3 = smov [#allocation13]   ;;  %s2680_s21 = scalar_lea.hbm %s3084_s9, 2048 }
  0x69   :  { %s102_s13 = sshll.u32 %s2746_s3, 4  ;;  %p2681_p6 = scmp.ne.s32.totalorder %s3084_s9, %s2680_s21  ;;  %s103_s13 = int_to_ptr.vmem [resolvable:$true] %s102_s13 }
  0x6a   :  { %p2684_p7 = scmp.lt.u32.totalorder %s2680_s21, %s3084_s9 }
  0x6c   :  { %p2686_p8 = pnand %p2684_p7, %p2681_p6 }
  0x6e   :  { %2689 = shalt.err (!%p2686_p8)
}
  0x6f   :  { %s2690_s18 = scalar_lea.vmem %s103_s13, 2048  ;;  %p2695_p10 = scmp.lt.s32.totalorder %s103_s13, %s103_s13 }
  0x70   :  { %p2691_p9 = scmp.ne.s32.totalorder %s103_s13, %s2690_s18  ;;  %p2696_p11 = scmp.lt.s32.totalorder %s2690_s18, %s2690_s18 }
  0x72   :  { %p2697_p12 = por %p2696_p11, %p2695_p10 }
  0x74   :  { %p2698_p13 = pnand %p2697_p12, %p2691_p9 }
  0x76   :  { %2701 = shalt.err (!%p2698_p13)
}
  0x77   :  { %108 = dma.hbm_to_vmem [thread:$0]  %s3084_s9, 2048, %s103_s13, [#allocation12], %s2740_s27, %s2740_s27, %s2741_s28  }
  0x78   :  { %2724 = dma.done.wait [#allocation3], 512  }
  0x79   :  { %2725 = vsyncadd [#allocation3], 4294966784 }
  0x7a   :  { %2726 = dma.done.wait [#allocation6], 28944  }
  0x7b   :  { %2727 = vsyncadd [#allocation6], 4294938352 }
  0x7c   :  { %2728 = dma.done.wait [#allocation9], 20480  }
  0x7d   :  { %2729 = vsyncadd [#allocation9], 4294946816 }
  0x7e   :  { %2730 = dma.done.wait [#allocation12], 4096  }
  0x7f   :  { %2731 = vsyncadd [#allocation12], 4294963200  ;;  %v137_v0 = vld [vmem:[#allocation5 + $0x8] sm:$0xff]  ;;  %v146_v1 = vld [vmem:[#allocation5 + $0x50] sm:$0xff]  ;;  %vm410_vm0 = vcmask 556032   ;;  %vm417_vm1 = vcmask 1043456  }
  0x80   :  { %v136_v2 = vld [vmem:[#allocation5] sm:$0xff]  ;;  %v2040_v3 = vpack.c.bf16 %v146_v1, %v137_v0  ;;  %v145_v4 = vld [vmem:[#allocation5 + $0x48] sm:$0xff]  ;;  %v139_v5 = vld [vmem:[#allocation5 + $0x18] sm:$0xff] }
  0x81   :  { %v148_v6 = vld [vmem:[#allocation5 + $0x60] sm:$0xff]  ;;  %v2042_v7 = vpack.c.bf16 %v145_v4, %v136_v2  ;;  %v155_v9 = vld [vmem:[#allocation5 + $0x98] sm:$0xff]  ;;  %v138_v11 = vld [vmem:[#allocation5 + $0x10] sm:$0xff] }
  0x82   :  { %v2088_v8 = vpack.c.bf16 %v148_v6, %v139_v5  ;;  %v164_v10 = vld [vmem:[#allocation5 + $0xe0] sm:$0xff]  ;;  %2041 = vmatprep.subr.bf16.mxu0 %v2040_v3  ;;  %v147_v13 = vld [vmem:[#allocation5 + $0x58] sm:$0xff]  ;;  %v154_v14 = vld [vmem:[#allocation5 + $0x90] sm:$0xff] }
  0x83   :  { %v2044_v12 = vpack.c.bf16 %v164_v10, %v155_v9  ;;  %v163_v15 = vld [vmem:[#allocation5 + $0xd8] sm:$0xff]  ;;  %2043 = vmatpush1.bf16.msra.mxu0 %v2042_v7  ;;  %v2090_v16 = vpack.c.bf16 %v147_v13, %v138_v11  ;;  %v157_v18 = vld [vmem:[#allocation5 + $0xa8] sm:$0xff]  ;;  %v166_v19 = vld [vmem:[#allocation5 + $0xf0] sm:$0xff] }
  0x84   :  { %2089 = vmatprep.subr.bf16.mxu1 %v2088_v8  ;;  %v2046_v17 = vpack.c.bf16 %v163_v15, %v154_v14  ;;  %v173_v20 = vld [vmem:[#allocation5 + $0x128] sm:$0xff]  ;;  %v2092_v21 = vpack.c.bf16 %v166_v19, %v157_v18  ;;  %v182_v22 = vld [vmem:[#allocation5 + $0x170] sm:$0xff]  ;;  %v156_v23 = vld [vmem:[#allocation5 + $0xa0] sm:$0xff] }
  0x85   :  { %2045 = vmatprep.subr.bf16.mxu0 %v2044_v12  ;;  %v165_v24 = vld [vmem:[#allocation5 + $0xe8] sm:$0xff]  ;;  %2091 = vmatpush1.bf16.msra.mxu1 %v2090_v16  ;;  %v2048_v25 = vpack.c.bf16 %v182_v22, %v173_v20  ;;  %v172_v27 = vld [vmem:[#allocation5 + $0x120] sm:$0xff]  ;;  %v175_v29 = vld [vmem:[#allocation5 + $0x138] sm:$0xff] }
  0x86   :  { %v2094_v26 = vpack.c.bf16 %v165_v24, %v156_v23  ;;  %v181_v28 = vld [vmem:[#allocation5 + $0x168] sm:$0xff]  ;;  %2093 = vmatprep.subr.bf16.mxu1 %v2092_v21  ;;  %v184_v30 = vld [vmem:[#allocation5 + $0x180] sm:$0xff]  ;;  %v191_v31 = vld [vmem:[#allocation5 + $0x1b8] sm:$0xff] }
  0x87   :  { %v200_v32 = vld [vmem:[#allocation5 + $0x200] sm:$0xff]  ;;  %2047 = vmatpush1.bf16.msra.mxu0 %v2046_v17  ;;  %v2050_v33 = vpack.c.bf16 %v181_v28, %v172_v27  ;;  %v2096_v34 = vpack.c.bf16 %v184_v30, %v175_v29  ;;  %v174_v35 = vld [vmem:[#allocation5 + $0x130] sm:$0xff]  ;;  %v183_v36 = vld [vmem:[#allocation5 + $0x178] sm:$0xff] }
  0x88   :  { %v190_v37 = vld [vmem:[#allocation5 + $0x1b0] sm:$0xff]  ;;  %2049 = vmatprep.subr.bf16.mxu0 %v2048_v25  ;;  %v2052_v38 = vpack.c.bf16 %v200_v32, %v191_v31  ;;  %v199_v39 = vld [vmem:[#allocation5 + $0x1f8] sm:$0xff]  ;;  %v193_v40 = vld [vmem:[#allocation5 + $0x1c8] sm:$0xff]  ;;  %v2098_v42 = vpack.c.bf16 %v183_v36, %v174_v35 }
  0x89   :  { %v202_v41 = vld [vmem:[#allocation5 + $0x210] sm:$0xff]  ;;  %2095 = vmatpush1.bf16.msra.mxu1 %v2094_v26  ;;  %v209_v43 = vld [vmem:[#allocation5 + $0x248] sm:$0xff]  ;;  %v192_v46 = vld [vmem:[#allocation5 + $0x1c0] sm:$0xff]  ;;  %v2054_v48 = vpack.c.bf16 %v199_v39, %v190_v37 }
  0x8a   :  { %v218_v44 = vld [vmem:[#allocation5 + $0x290] sm:$0xff]  ;;  %2097 = vmatprep.subr.bf16.mxu1 %v2096_v34  ;;  %v2100_v45 = vpack.c.bf16 %v202_v41, %v193_v40  ;;  %v201_v47 = vld [vmem:[#allocation5 + $0x208] sm:$0xff]  ;;  %v211_v49 = vld [vmem:[#allocation5 + $0x258] sm:$0xff] }
  0x8b   :  { %2051 = vmatpush1.bf16.msra.mxu0 %v2050_v33  ;;  %v220_v50 = vld [vmem:[#allocation5 + $0x2a0] sm:$0xff]  ;;  %v2056_v51 = vpack.c.bf16 %v218_v44, %v209_v43  ;;  %v217_v53 = vld [vmem:[#allocation5 + $0x288] sm:$0xff]  ;;  %v2102_v54 = vpack.c.bf16 %v201_v47, %v192_v46  ;;  %v227_v55 = vld [vmem:[#allocation5 + $0x2d8] sm:$0xff] }
  0x8c   :  { %2053 = vmatprep.subr.bf16.mxu0 %v2052_v38  ;;  %v208_v52 = vld [vmem:[#allocation5 + $0x240] sm:$0xff]  ;;  %v2104_v57 = vpack.c.bf16 %v220_v50, %v211_v49  ;;  %v210_v58 = vld [vmem:[#allocation5 + $0x250] sm:$0xff]  ;;  %v219_v59 = vld [vmem:[#allocation5 + $0x298] sm:$0xff] }
  0x8d   :  { %2099 = vmatpush1.bf16.msra.mxu1 %v2098_v42  ;;  %v236_v56 = vld [vmem:[#allocation5 + $0x320] sm:$0xff]  ;;  %v2058_v60 = vpack.c.bf16 %v217_v53, %v208_v52  ;;  %v229_v61 = vld [vmem:[#allocation5 + $0x2e8] sm:$0xff]  ;;  %v238_v62 = vld [vmem:[#allocation5 + $0x330] sm:$0xff]  ;;  %v2106_v2 = vpack.c.bf16 %v219_v59, %v210_v58 }
  0x8e   :  { %2101 = vmatprep.subr.bf16.mxu1 %v2100_v45  ;;  %v2060_v63 = vpack.c.bf16 %v236_v56, %v227_v55  ;;  %v226_v0 = vld [vmem:[#allocation5 + $0x2d0] sm:$0xff]  ;;  %v235_v1 = vld [vmem:[#allocation5 + $0x318] sm:$0xff]  ;;  %v245_v3 = vld [vmem:[#allocation5 + $0x368] sm:$0xff]  ;;  %v2108_v5 = vpack.c.bf16 %v238_v62, %v229_v61 }
  0x8f   :  { %2055 = vmatpush1.bf16.msra.mxu0 %v2054_v48  ;;  %v254_v4 = vld [vmem:[#allocation5 + $0x3b0] sm:$0xff]  ;;  %v228_v6 = vld [vmem:[#allocation5 + $0x2e0] sm:$0xff]  ;;  %v237_v7 = vld [vmem:[#allocation5 + $0x328] sm:$0xff]  ;;  %v2062_v8 = vpack.c.bf16 %v235_v1, %v226_v0 }
  0x90   :  { %2057 = vmatprep.subr.bf16.mxu0 %v2056_v51  ;;  %v247_v9 = vld [vmem:[#allocation5 + $0x378] sm:$0xff]  ;;  %v256_v10 = vld [vmem:[#allocation5 + $0x3c0] sm:$0xff]  ;;  %v2064_v11 = vpack.c.bf16 %v254_v4, %v245_v3  ;;  %v253_v13 = vld [vmem:[#allocation5 + $0x3a8] sm:$0xff]  ;;  %v2110_v14 = vpack.c.bf16 %v237_v7, %v228_v6 }
  0x91   :  { %2103 = vmatpush1.bf16.msra.mxu1 %v2102_v54  ;;  %v244_v12 = vld [vmem:[#allocation5 + $0x360] sm:$0xff]  ;;  %v263_v15 = vld [vmem:[#allocation5 + $0x3f8] sm:$0xff]  ;;  %v2112_v17 = vpack.c.bf16 %v256_v10, %v247_v9  ;;  %v246_v18 = vld [vmem:[#allocation5 + $0x370] sm:$0xff] }
  0x92   :  { %2105 = vmatprep.subr.bf16.mxu1 %v2104_v57  ;;  %v272_v16 = vld [vmem:[#allocation5 + $0x440] sm:$0xff]  ;;  %v255_v19 = vld [vmem:[#allocation5 + $0x3b8] sm:$0xff]  ;;  %v2066_v20 = vpack.c.bf16 %v253_v13, %v244_v12  ;;  %v265_v21 = vld [vmem:[#allocation5 + $0x408] sm:$0xff] }
  0x93   :  { %2059 = vmatpush1.bf16.msra.mxu0 %v2058_v60  ;;  %v274_v22 = vld [vmem:[#allocation5 + $0x450] sm:$0xff]  ;;  %v2068_v23 = vpack.c.bf16 %v272_v16, %v263_v15  ;;  %v271_v25 = vld [vmem:[#allocation5 + $0x438] sm:$0xff]  ;;  %v2114_v26 = vpack.c.bf16 %v255_v19, %v246_v18  ;;  %v281_v27 = vld [vmem:[#allocation5 + $0x488] sm:$0xff] }
  0x94   :  { %2061 = vmatprep.subr.bf16.mxu0 %v2060_v63  ;;  %v262_v24 = vld [vmem:[#allocation5 + $0x3f0] sm:$0xff]  ;;  %v2116_v29 = vpack.c.bf16 %v274_v22, %v265_v21  ;;  %v264_v30 = vld [vmem:[#allocation5 + $0x400] sm:$0xff]  ;;  %v273_v31 = vld [vmem:[#allocation5 + $0x448] sm:$0xff] }
  0x95   :  { %2107 = vmatpush1.bf16.msra.mxu1 %v2106_v2  ;;  %v290_v28 = vld [vmem:[#allocation5 + $0x4d0] sm:$0xff]  ;;  %v2070_v32 = vpack.c.bf16 %v271_v25, %v262_v24  ;;  %v283_v33 = vld [vmem:[#allocation5 + $0x498] sm:$0xff]  ;;  %v292_v34 = vld [vmem:[#allocation5 + $0x4e0] sm:$0xff]  ;;  %v2118_v38 = vpack.c.bf16 %v273_v31, %v264_v30 }
  0x96   :  { %2109 = vmatprep.subr.bf16.mxu1 %v2108_v5  ;;  %v2072_v35 = vpack.c.bf16 %v290_v28, %v281_v27  ;;  %v280_v36 = vld [vmem:[#allocation5 + $0x480] sm:$0xff]  ;;  %v289_v37 = vld [vmem:[#allocation5 + $0x4c8] sm:$0xff]  ;;  %v299_v39 = vld [vmem:[#allocation5 + $0x518] sm:$0xff]  ;;  %v2120_v41 = vpack.c.bf16 %v292_v34, %v283_v33 }
  0x97   :  { %2063 = vmatpush1.bf16.msra.mxu0 %v2062_v8  ;;  %v308_v40 = vld [vmem:[#allocation5 + $0x560] sm:$0xff]  ;;  %v282_v42 = vld [vmem:[#allocation5 + $0x490] sm:$0xff]  ;;  %v291_v43 = vld [vmem:[#allocation5 + $0x4d8] sm:$0xff]  ;;  %v2074_v44 = vpack.c.bf16 %v289_v37, %v280_v36 }
  0x98   :  { %2065 = vmatprep.subr.bf16.mxu0 %v2064_v11  ;;  %v301_v45 = vld [vmem:[#allocation5 + $0x528] sm:$0xff]  ;;  %v310_v46 = vld [vmem:[#allocation5 + $0x570] sm:$0xff]  ;;  %v2076_v48 = vpack.c.bf16 %v308_v40, %v299_v39  ;;  %v307_v50 = vld [vmem:[#allocation5 + $0x558] sm:$0xff]  ;;  %v2122_v51 = vpack.c.bf16 %v291_v43, %v282_v42 }
  0x99   :  { %2111 = vmatpush1.bf16.msra.mxu1 %v2110_v14  ;;  %v2917_v47 = vld [vmem:[#allocation2 + $0x8] sm:$0xff]  ;;  %v298_v49 = vld [vmem:[#allocation5 + $0x510] sm:$0xff]  ;;  %v2124_v54 = vpack.c.bf16 %v310_v46, %v301_v45  ;;  %v300_v55 = vld [vmem:[#allocation5 + $0x520] sm:$0xff] }
  0x9a   :  { %2113 = vmatprep.subr.bf16.mxu1 %v2112_v17  ;;  %1807 = vmatprep.mubr.msk.f32.mxu0 %vm410_vm0, %v2917_v47  ;;  %v317_v52 = vld [vmem:[#allocation5 + $0x5a8] sm:$0xff]  ;;  %v326_v53 = vld [vmem:[#allocation5 + $0x5f0] sm:$0xff]  ;;  %v2078_v57 = vpack.c.bf16 %v307_v50, %v298_v49  ;;  %v319_v58 = vld [vmem:[#allocation5 + $0x5b8] sm:$0xff] }
  0x9b   :  { %2067 = vmatpush1.bf16.msra.mxu0 %v2066_v20  ;;  %1811 = vmatprep.mubr.msk.f32.mxu1 %vm410_vm0, %v2917_v47  ;;  %v309_v56 = vld [vmem:[#allocation5 + $0x568] sm:$0xff]  ;;  %v328_v59 = vld [vmem:[#allocation5 + $0x600] sm:$0xff]  ;;  %v2080_v60 = vpack.c.bf16 %v326_v53, %v317_v52  ;;  %v335_v0 = vld [vmem:[#allocation5 + $0x638] sm:$0xff] }
  0x9c   :  { %2069 = vmatprep.subr.bf16.mxu0 %v2068_v23  ;;  %v316_v61 = vld [vmem:[#allocation5 + $0x5a0] sm:$0xff]  ;;  %v325_v62 = vld [vmem:[#allocation5 + $0x5e8] sm:$0xff]  ;;  %v2126_v63 = vpack.c.bf16 %v309_v56, %v300_v55  ;;  %v2128_v2 = vpack.c.bf16 %v328_v59, %v319_v58  ;;  %v318_v3 = vld [vmem:[#allocation5 + $0x5b0] sm:$0xff] }
  0x9d   :  { %2115 = vmatpush1.bf16.msra.mxu1 %v2114_v26  ;;  %v344_v1 = vld [vmem:[#allocation5 + $0x680] sm:$0xff]  ;;  %v327_v4 = vld [vmem:[#allocation5 + $0x5f8] sm:$0xff]  ;;  %v2082_v5 = vpack.c.bf16 %v325_v62, %v316_v61  ;;  %v337_v6 = vld [vmem:[#allocation5 + $0x648] sm:$0xff] }
  0x9e   :  { %2117 = vmatprep.subr.bf16.mxu1 %v2116_v29  ;;  %v346_v7 = vld [vmem:[#allocation5 + $0x690] sm:$0xff]  ;;  %v2084_v8 = vpack.c.bf16 %v344_v1, %v335_v0  ;;  %v343_v10 = vld [vmem:[#allocation5 + $0x678] sm:$0xff]  ;;  %v2130_v11 = vpack.c.bf16 %v327_v4, %v318_v3  ;;  %v336_v13 = vld [vmem:[#allocation5 + $0x640] sm:$0xff] }
  0x9f   :  { %2071 = vmatpush1.bf16.msra.mxu0 %v2070_v32  ;;  %v334_v9 = vld [vmem:[#allocation5 + $0x630] sm:$0xff]  ;;  %v2132_v12 = vpack.c.bf16 %v346_v7, %v337_v6  ;;  %v345_v14 = vld [vmem:[#allocation5 + $0x688] sm:$0xff]  ;;  %v352_v20 = vld [vmem:[#allocation5 + $0x6c0] sm:$0xf] }
  0xa0   :  { %2073 = vmatprep.subr.bf16.mxu0 %v2072_v35  ;;  %v2086_v15 = vpack.c.bf16 %v343_v10, %v334_v9  ;;  %v353_v16 = vld [vmem:[#allocation5 + $0x6c8] sm:$0xf]  ;;  %v2134_v17 = vpack.c.bf16 %v345_v14, %v336_v13  ;;  %v150_v19 = vld [vmem:[#allocation5 + $0x70] sm:$0xff]  ;;  %v140_v21 = vld [vmem:[#allocation5 + $0x20] sm:$0xff] }
  0xa1   :  { %2119 = vmatpush1.bf16.msra.mxu1 %v2118_v38  ;;  %v141_v18 = vld [vmem:[#allocation5 + $0x28] sm:$0xff]  ;;  %v2923_v23 = vld [vmem:[#allocation2] sm:$0xff]  ;;  %v355_v24 = vld [vmem:[#allocation5 + $0x6d8] sm:$0xf] }
  0xa2   :  { %2121 = vmatprep.subr.bf16.mxu1 %v2120_v41  ;;  %v149_v22 = vld [vmem:[#allocation5 + $0x68] sm:$0xff]  ;;  %v159_v25 = vld [vmem:[#allocation5 + $0xb8] sm:$0xff]  ;;  %v168_v26 = vld [vmem:[#allocation5 + $0x100] sm:$0xff]  ;;  %v2136_v27 = vpack.c.bf16 %v150_v19, %v141_v18 }
  0xa3   :  { %2075 = vmatpush1.bf16.msra.mxu0 %v2074_v44  ;;  %v354_v28 = vld [vmem:[#allocation5 + $0x6d0] sm:$0xf]  ;;  %v143_v29 = vld [vmem:[#allocation5 + $0x38] sm:$0xff]  ;;  %v152_v30 = vld [vmem:[#allocation5 + $0x80] sm:$0xff]  ;;  %v2138_v31 = vpack.c.bf16 %v149_v22, %v140_v21  ;;  %v2140_v35 = vpack.c.bf16 %v168_v26, %v159_v25 }
  0xa4   :  { %2077 = vmatprep.subr.bf16.mxu0 %v2076_v48  ;;  %v158_v32 = vld [vmem:[#allocation5 + $0xb0] sm:$0xff]  ;;  %v151_v34 = vld [vmem:[#allocation5 + $0x78] sm:$0xff]  ;;  %v161_v37 = vld [vmem:[#allocation5 + $0xc8] sm:$0xff]  ;;  %v2184_v39 = vpack.c.bf16 %v152_v30, %v143_v29 }
  0xa5   :  { %2123 = vmatpush1.bf16.msra.mxu1 %v2122_v51  ;;  %v142_v33 = vld [vmem:[#allocation5 + $0x30] sm:$0xff]  ;;  %v167_v36 = vld [vmem:[#allocation5 + $0xf8] sm:$0xff]  ;;  %v177_v40 = vld [vmem:[#allocation5 + $0x148] sm:$0xff] }
  0xa6   :  { %2125 = vmatprep.subr.bf16.mxu1 %v2124_v54  ;;  %v170_v38 = vld [vmem:[#allocation5 + $0x110] sm:$0xff]  ;;  %v2186_v42 = vpack.c.bf16 %v151_v34, %v142_v33  ;;  %v2142_v43 = vpack.c.bf16 %v167_v36, %v158_v32  ;;  %v176_v45 = vld [vmem:[#allocation5 + $0x140] sm:$0xff]  ;;  %v169_v48 = vld [vmem:[#allocation5 + $0x108] sm:$0xff] }
  0xa7   :  { %2079 = vmatpush1.bf16.msra.mxu0 %v2078_v57  ;;  %v186_v41 = vld [vmem:[#allocation5 + $0x190] sm:$0xff]  ;;  %v2188_v44 = vpack.c.bf16 %v170_v38, %v161_v37  ;;  %v160_v46 = vld [vmem:[#allocation5 + $0xc0] sm:$0xff]  ;;  %v185_v50 = vld [vmem:[#allocation5 + $0x188] sm:$0xff] }
  0xa8   :  { %2081 = vmatprep.subr.bf16.mxu0 %v2080_v60  ;;  %v2144_v49 = vpack.c.bf16 %v186_v41, %v177_v40  ;;  %v179_v51 = vld [vmem:[#allocation5 + $0x158] sm:$0xff]  ;;  %v188_v52 = vld [vmem:[#allocation5 + $0x1a0] sm:$0xff]  ;;  %v2190_v55 = vpack.c.bf16 %v169_v48, %v160_v46  ;;  %v2146_v56 = vpack.c.bf16 %v185_v50, %v176_v45  ;;  %v194_v58 = vld [vmem:[#allocation5 + $0x1d0] sm:$0xff] }
  0xa9   :  { %2127 = vmatpush1.bf16.msra.mxu1 %v2126_v63  ;;  %v195_v53 = vld [vmem:[#allocation5 + $0x1d8] sm:$0xff]  ;;  %v204_v54 = vld [vmem:[#allocation5 + $0x220] sm:$0xff]  ;;  %v2192_v57 = vpack.c.bf16 %v188_v52, %v179_v51  ;;  %v178_v59 = vld [vmem:[#allocation5 + $0x150] sm:$0xff] }
  0xaa   :  { %2129 = vmatprep.subr.bf16.mxu1 %v2128_v2  ;;  %v187_v60 = vld [vmem:[#allocation5 + $0x198] sm:$0xff]  ;;  %v2148_v61 = vpack.c.bf16 %v204_v54, %v195_v53  ;;  %v197_v63 = vld [vmem:[#allocation5 + $0x1e8] sm:$0xff]  ;;  %v206_v0 = vld [vmem:[#allocation5 + $0x230] sm:$0xff] }
  0xab   :  { %2083 = vmatpush1.bf16.msra.mxu0 %v2082_v5  ;;  %v203_v62 = vld [vmem:[#allocation5 + $0x218] sm:$0xff]  ;;  %v213_v1 = vld [vmem:[#allocation5 + $0x268] sm:$0xff]  ;;  %v222_v2 = vld [vmem:[#allocation5 + $0x2b0] sm:$0xff]  ;;  %v2194_v3 = vpack.c.bf16 %v187_v60, %v178_v59  ;;  %v2196_v6 = vpack.c.bf16 %v206_v0, %v197_v63 }
  0xac   :  { %2085 = vmatprep.subr.bf16.mxu0 %v2084_v8  ;;  %v212_v4 = vld [vmem:[#allocation5 + $0x260] sm:$0xff]  ;;  %v2150_v5 = vpack.c.bf16 %v203_v62, %v194_v58  ;;  %v221_v7 = vld [vmem:[#allocation5 + $0x2a8] sm:$0xff]  ;;  %v2152_v10 = vpack.c.bf16 %v222_v2, %v213_v1  ;;  %v2931_v13 = vld [vmem:[#allocation2 + $0x18] sm:$0xff] }
  0xad   :  { %2131 = vmatpush1.bf16.msra.mxu1 %v2130_v11  ;;  %v196_v8 = vld [vmem:[#allocation5 + $0x1e0] sm:$0xff]  ;;  %v205_v9 = vld [vmem:[#allocation5 + $0x228] sm:$0xff]  ;;  %v215_v11 = vld [vmem:[#allocation5 + $0x278] sm:$0xff]  ;;  %v2154_v18 = vpack.c.bf16 %v221_v7, %v212_v4 }
  0xae   :  { %2133 = vmatprep.subr.bf16.mxu1 %v2132_v12  ;;  %v224_v12 = vld [vmem:[#allocation5 + $0x2c0] sm:$0xff]  ;;  %v231_v14 = vld [vmem:[#allocation5 + $0x2f8] sm:$0xff]  ;;  %v214_v21 = vld [vmem:[#allocation5 + $0x270] sm:$0xff] }
  0xaf   :  { %2087 = vmatpush1.bf16.msra.mxu0 %v2086_v15  ;;  %v240_v15 = vld [vmem:[#allocation5 + $0x340] sm:$0xff]  ;;  %v2200_v19 = vpack.c.bf16 %v224_v12, %v215_v11  ;;  %v223_v22 = vld [vmem:[#allocation5 + $0x2b8] sm:$0xff]  ;;  %v233_v26 = vld [vmem:[#allocation5 + $0x308] sm:$0xff] }
  0xb0   :  { %1805 = vmatprep.subr.msk.mxu0 %vm417_vm1, %v353_v16  ;;  %v2198_v16 = vpack.c.bf16 %v205_v9, %v196_v8  ;;  %v239_v25 = vld [vmem:[#allocation5 + $0x338] sm:$0xff]  ;;  %v258_v29 = vld [vmem:[#allocation5 + $0x3d0] sm:$0xff]  ;;  %v2202_v30 = vpack.c.bf16 %v223_v22, %v214_v21  ;;  %v248_v33 = vld [vmem:[#allocation5 + $0x380] sm:$0xff] }
  0xb1   :  { %2135 = vmatpush1.bf16.msra.mxu1 %v2134_v17  ;;  %v2937_v17 = vld [vmem:[#allocation2 + $0x10] sm:$0xff]  ;;  %v232_v34 = vld [vmem:[#allocation5 + $0x300] sm:$0xff]  ;;  %v257_v37 = vld [vmem:[#allocation5 + $0x3c8] sm:$0xff] }
  0xb2   :  { %1809 = vmatprep.subr.msk.mxu1 %vm417_vm1, %v355_v24  ;;  %v2156_v24 = vpack.c.bf16 %v240_v15, %v231_v14  ;;  %v251_v38 = vld [vmem:[#allocation5 + $0x398] sm:$0xff]  ;;  %v276_v41 = vld [vmem:[#allocation5 + $0x460] sm:$0xff]  ;;  %v266_v45 = vld [vmem:[#allocation5 + $0x410] sm:$0xff] }
  0xb3   :  { %1806 = vmatpush1.msk.msra.mxu0 %vm417_vm1, %v352_v20  ;;  %v230_v20 = vld [vmem:[#allocation5 + $0x2f0] sm:$0xff]  ;;  %v267_v40 = vld [vmem:[#allocation5 + $0x418] sm:$0xff]  ;;  %v269_v51 = vld [vmem:[#allocation5 + $0x428] sm:$0xff] }
  0xb4   :  { %510 = vmatmul.mubr.f32.vlgmr.msra.gmra.mrb[0].mxu0 %v2923_v23  ;;  %2137 = vmatprep.subr.bf16.mxu0 %v2136_v27  ;;  %v242_v27 = vld [vmem:[#allocation5 + $0x350] sm:$0xff]  ;;  %v259_v48 = vld [vmem:[#allocation5 + $0x3d8] sm:$0xff]  ;;  %v285_v53 = vld [vmem:[#allocation5 + $0x4a8] sm:$0xff] }
  0xb5   :  { %2139 = vmatpush1.bf16.msra.mxu0 %v2138_v31  ;;  %1810 = vmatpush1.msk.msra.mxu1 %vm417_vm1, %v354_v28  ;;  %v249_v28 = vld [vmem:[#allocation5 + $0x388] sm:$0xff]  ;;  %v2158_v31 = vpack.c.bf16 %v239_v25, %v230_v20  ;;  %v2204_v32 = vpack.c.bf16 %v242_v27, %v233_v26  ;;  %v250_v46 = vld [vmem:[#allocation5 + $0x390] sm:$0xff]  ;;  %v275_v50 = vld [vmem:[#allocation5 + $0x458] sm:$0xff] }
  0xb6   :  { %587 = vmatmul.mubr.f32.vlgmr.msra.gmra.mrb[0].mxu1 %v2923_v23  ;;  %2141 = vmatprep.subr.bf16.mxu0 %v2140_v35  ;;  %v241_v35 = vld [vmem:[#allocation5 + $0x348] sm:$0xff]  ;;  %v2160_v36 = vpack.c.bf16 %v258_v29, %v249_v28  ;;  %v278_v52 = vld [vmem:[#allocation5 + $0x470] sm:$0xff]  ;;  %v284_v58 = vld [vmem:[#allocation5 + $0x4a0] sm:$0xff] }
  0xb7   :  { %2185 = vmatprep.subr.bf16.mxu1 %v2184_v39  ;;  %1808 = vmatprep.mubr.msk.f32.mxu0 %vm410_vm0, %v2931_v13  ;;  %v260_v39 = vld [vmem:[#allocation5 + $0x3e0] sm:$0xff]  ;;  %v294_v54 = vld [vmem:[#allocation5 + $0x4f0] sm:$0xff]  ;;  %v277_v60 = vld [vmem:[#allocation5 + $0x468] sm:$0xff] }
  0xb8   :  { %2187 = vmatpush1.bf16.msra.mxu1 %v2186_v42  ;;  %1812 = vmatprep.mubr.msk.f32.mxu1 %vm410_vm0, %v2931_v13  ;;  %v2206_v42 = vpack.c.bf16 %v241_v35, %v232_v34  ;;  %v268_v59 = vld [vmem:[#allocation5 + $0x420] sm:$0xff]  ;;  %v293_v62 = vld [vmem:[#allocation5 + $0x4e8] sm:$0xff]  ;;  %v287_v63 = vld [vmem:[#allocation5 + $0x4b8] sm:$0xff] }
  0xb9   :  { %2143 = vmatpush1.bf16.msra.mxu0 %v2142_v43  ;;  %2189 = vmatprep.subr.bf16.mxu1 %v2188_v44  ;;  %v2162_v43 = vpack.c.bf16 %v257_v37, %v248_v33  ;;  %v2208_v44 = vpack.c.bf16 %v260_v39, %v251_v38  ;;  %v296_v0 = vld [vmem:[#allocation5 + $0x500] sm:$0xff]  ;;  %v303_v1 = vld [vmem:[#allocation5 + $0x538] sm:$0xff]  ;;  %v2170_v4 = vpack.c.bf16 %v293_v62, %v284_v58  ;;  %v286_v7 = vld [vmem:[#allocation5 + $0x4b0] sm:$0xff] }
  0xba   :  { %2145 = vmatprep.subr.bf16.mxu0 %v2144_v49  ;;  %516 = vmatmul.mubr.f32.gmra.mrb[2].mxu0 %v2937_v17  ;;  %v2164_v49 = vpack.c.bf16 %v276_v41, %v267_v40  ;;  %v312_v2 = vld [vmem:[#allocation5 + $0x580] sm:$0xff]  ;;  %v295_v8 = vld [vmem:[#allocation5 + $0x4f8] sm:$0xff]  ;;  %v305_v11 = vld [vmem:[#allocation5 + $0x548] sm:$0xff] }
  0xbb   :  { %593 = vmatmul.mubr.f32.gmra.mrb[2].mxu1 %v2937_v17  ;;  %1815 = vmatprep.mubr.msk.f32.mxu0 %vm410_vm0, %v2917_v47  ;;  %v2172_v9 = vpack.c.bf16 %v312_v2, %v303_v1  ;;  %v314_v12 = vld [vmem:[#allocation5 + $0x590] sm:$0xff]  ;;  %v321_v14 = vld [vmem:[#allocation5 + $0x5c8] sm:$0xff]  ;;  %v320_v20 = vld [vmem:[#allocation5 + $0x5c0] sm:$0xff] }
  0xbc   :  { %2191 = vmatpush1.bf16.msra.mxu1 %v2190_v55  ;;  %1819 = vmatprep.mubr.msk.f32.mxu1 %vm410_vm0, %v2917_v47  ;;  %v2210_v55 = vpack.c.bf16 %v259_v48, %v250_v46  ;;  %v330_v15 = vld [vmem:[#allocation5 + $0x610] sm:$0xff]  ;;  %v304_v21 = vld [vmem:[#allocation5 + $0x540] sm:$0xff]  ;;  %v313_v22 = vld [vmem:[#allocation5 + $0x588] sm:$0xff] }
  0xbd   :  { %2147 = vmatpush1.bf16.msra.mxu0 %v2146_v56  ;;  %2193 = vmatprep.subr.bf16.mxu1 %v2192_v57  ;;  %v2166_v56 = vpack.c.bf16 %v275_v50, %v266_v45  ;;  %v2212_v57 = vpack.c.bf16 %v278_v52, %v269_v51  ;;  %v329_v25 = vld [vmem:[#allocation5 + $0x608] sm:$0xff]  ;;  %v323_v26 = vld [vmem:[#allocation5 + $0x5d8] sm:$0xff]  ;;  %v332_v27 = vld [vmem:[#allocation5 + $0x620] sm:$0xff] }
  0xbe   :  { %2149 = vmatprep.subr.bf16.mxu0 %v2148_v61  ;;  %v2168_v61 = vpack.c.bf16 %v294_v54, %v285_v53  ;;  %v339_v28 = vld [vmem:[#allocation5 + $0x658] sm:$0xff]  ;;  %v348_v29 = vld [vmem:[#allocation5 + $0x6a0] sm:$0xff]  ;;  %v338_v33 = vld [vmem:[#allocation5 + $0x650] sm:$0xff] }
  0xbf   :  { %v322_v34 = vld [vmem:[#allocation5 + $0x5d0] sm:$0xff]  ;;  %v331_v35 = vld [vmem:[#allocation5 + $0x618] sm:$0xff]  ;;  %v341_v38 = vld [vmem:[#allocation5 + $0x668] sm:$0xff] }
  0xc0   :  { %2195 = vmatpush1.bf16.msra.mxu1 %v2194_v3  ;;  %v2214_v3 = vpack.c.bf16 %v277_v60, %v268_v59  ;;  %v347_v37 = vld [vmem:[#allocation5 + $0x698] sm:$0xff]  ;;  %v350_v39 = vld [vmem:[#allocation5 + $0x6b0] sm:$0xff]  ;;  %v2226_v40 = vpack.c.bf16 %v331_v35, %v322_v34  ;;  %v357_v45 = vld [vmem:[#allocation5 + $0x6e8] sm:$0xf] }
  0xc1   :  { %2151 = vmatpush1.bf16.msra.mxu0 %v2150_v5  ;;  %2197 = vmatprep.subr.bf16.mxu1 %v2196_v6  ;;  %v2216_v5 = vpack.c.bf16 %v296_v0, %v287_v63  ;;  %v302_v6 = vld [vmem:[#allocation5 + $0x530] sm:$0xff]  ;;  %v2182_v41 = vpack.c.bf16 %v347_v37, %v338_v33  ;;  %v144_v48 = vld [vmem:[#allocation5 + $0x40] sm:$0xff]  ;;  %v359_v51 = vld [vmem:[#allocation5 + $0x6f8] sm:$0xf]  ;;  %v2748_v63 = vmov 0.0  }
  0xc2   :  { %2153 = vmatprep.subr.bf16.mxu0 %v2152_v10  ;;  %v311_v10 = vld [vmem:[#allocation5 + $0x578] sm:$0xff]  ;;  %v356_v50 = vld [vmem:[#allocation5 + $0x6e0] sm:$0xf]  ;;  %v162_v53 = vld [vmem:[#allocation5 + $0xd0] sm:$0xff] }
  0xc3   :  { %v171_v54 = vld [vmem:[#allocation5 + $0x118] sm:$0xff]  ;;  %v180_v58 = vld [vmem:[#allocation5 + $0x160] sm:$0xff]  ;;  %v189_v59 = vld [vmem:[#allocation5 + $0x1a8] sm:$0xff] }
  0xc4   :  { %2199 = vmatpush1.bf16.msra.mxu1 %v2198_v16  ;;  %v2218_v16 = vpack.c.bf16 %v295_v8, %v286_v7  ;;  %v2239_v60 = vpack.c.bf16 %v189_v59, %v180_v58  ;;  %v207_v62 = vld [vmem:[#allocation5 + $0x238] sm:$0xff]  ;;  %v216_v1 = vld [vmem:[#allocation5 + $0x280] sm:$0xff]  ;;  %v225_v2 = vld [vmem:[#allocation5 + $0x2c8] sm:$0xff] }
  0xc5   :  { %2155 = vmatpush1.bf16.msra.mxu0 %v2154_v18  ;;  %2201 = vmatprep.subr.bf16.mxu1 %v2200_v19  ;;  %v2174_v18 = vpack.c.bf16 %v311_v10, %v302_v6  ;;  %v2220_v19 = vpack.c.bf16 %v314_v12, %v305_v11  ;;  %v252_v6 = vld [vmem:[#allocation5 + $0x3a0] sm:$0xff]  ;;  %v261_v7 = vld [vmem:[#allocation5 + $0x3e8] sm:$0xff]  ;;  %v279_v10 = vld [vmem:[#allocation5 + $0x478] sm:$0xff] }
  0xc6   :  { %2157 = vmatprep.subr.bf16.mxu0 %v2156_v24  ;;  %v2176_v24 = vpack.c.bf16 %v330_v15, %v321_v14  ;;  %v2251_v8 = vpack.c.bf16 %v261_v7, %v252_v6  ;;  %v288_v12 = vld [vmem:[#allocation5 + $0x4c0] sm:$0xff]  ;;  %v297_v14 = vld [vmem:[#allocation5 + $0x508] sm:$0xff]  ;;  %v862_v33 = vld [vmem:[#allocation8] sm:$0xff] }
  0xc7   :  { %v2257_v15 = vpack.c.bf16 %v297_v14, %v288_v12  ;;  %v871_v34 = vld [vmem:[#allocation8 + $0x48] sm:$0xff]  ;;  %v866_v37 = vld [vmem:[#allocation8 + $0x20] sm:$0xff]  ;;  %v920_v6 = vld [vmem:[#allocation8 + $0x1d0] sm:$0xff] }
  0xc8   :  { %2203 = vmatpush1.bf16.msra.mxu1 %v2202_v30  ;;  %v2222_v30 = vpack.c.bf16 %v313_v22, %v304_v21  ;;  %v333_v21 = vld [vmem:[#allocation5 + $0x628] sm:$0xff]  ;;  %v902_v58 = vld [vmem:[#allocation8 + $0x140] sm:$0xff]  ;;  %v911_v59 = vld [vmem:[#allocation8 + $0x188] sm:$0xff] }
  0xc9   :  { %2159 = vmatpush1.bf16.msra.mxu0 %v2158_v31  ;;  %2205 = vmatprep.subr.bf16.mxu1 %v2204_v32  ;;  %v2178_v31 = vpack.c.bf16 %v329_v25, %v320_v20  ;;  %v2224_v32 = vpack.c.bf16 %v332_v27, %v323_v26  ;;  %v324_v20 = vld [vmem:[#allocation5 + $0x5e0] sm:$0xff]  ;;  %v351_v25 = vld [vmem:[#allocation5 + $0x6b8] sm:$0xff]  ;;  %v929_v7 = vld [vmem:[#allocation8 + $0x218] sm:$0xff] }
  0xca   :  { %2161 = vmatprep.subr.bf16.mxu0 %v2160_v36  ;;  %v2180_v36 = vpack.c.bf16 %v348_v29, %v339_v28  ;;  %v2263_v22 = vpack.c.bf16 %v333_v21, %v324_v20  ;;  %v360_v27 = vld [vmem:[#allocation5 + $0x700] sm:$0xf]  ;;  %v2346_v14 = vpack.c.bf16 %v929_v7, %v920_v6 }
  0xcb   :  { %v863_v28 = vld [vmem:[#allocation8 + $0x8] sm:$0xff]  ;;  %v872_v29 = vld [vmem:[#allocation8 + $0x50] sm:$0xff] }
  0xcc   :  { %2207 = vmatpush1.bf16.msra.mxu1 %v2206_v42  ;;  %v2228_v42 = vpack.c.bf16 %v350_v39, %v341_v38  ;;  %v875_v38 = vld [vmem:[#allocation8 + $0x68] sm:$0xff]  ;;  %v881_v39 = vld [vmem:[#allocation8 + $0x98] sm:$0xff] }
  0xcd   :  { %2163 = vmatpush1.bf16.msra.mxu0 %v2162_v43  ;;  %2209 = vmatprep.subr.bf16.mxu1 %v2208_v44  ;;  %v340_v43 = vld [vmem:[#allocation5 + $0x660] sm:$0xff]  ;;  %v349_v44 = vld [vmem:[#allocation5 + $0x6a8] sm:$0xff] }
  0xce   :  { %2165 = vmatprep.subr.bf16.mxu0 %v2164_v49  ;;  %v2230_v46 = vpack.c.bf16 %v349_v44, %v340_v43  ;;  %v153_v49 = vld [vmem:[#allocation5 + $0x88] sm:$0xff]  ;;  %v947_v21 = vld [vmem:[#allocation8 + $0x2a8] sm:$0xff] }
  0xcf   :  { %v2233_v52 = vpack.c.bf16 %v153_v49, %v144_v48  ;;  %v880_v43 = vld [vmem:[#allocation8 + $0x90] sm:$0xff]  ;;  %v889_v44 = vld [vmem:[#allocation8 + $0xd8] sm:$0xff]  ;;  %v899_v49 = vld [vmem:[#allocation8 + $0x128] sm:$0xff] }
  0xd0   :  { %2211 = vmatpush1.bf16.msra.mxu1 %v2210_v55  ;;  %v358_v55 = vld [vmem:[#allocation5 + $0x6f0] sm:$0xf] }
  0xd1   :  { %2167 = vmatpush1.bf16.msra.mxu0 %v2166_v56  ;;  %2213 = vmatprep.subr.bf16.mxu1 %v2212_v57  ;;  %v2747_v56 = vmov 0.0|0.0   ;;  %v2236_v57 = vpack.c.bf16 %v171_v54, %v162_v53  ;;  %v893_v48 = vld [vmem:[#allocation8 + $0xf8] sm:$0xff]  ;;  %v903_v53 = vld [vmem:[#allocation8 + $0x148] sm:$0xff]  ;;  %v912_v54 = vld [vmem:[#allocation8 + $0x190] sm:$0xff] }
  0xd2   :  { %2169 = vmatprep.subr.bf16.mxu0 %v2168_v61  ;;  %v198_v61 = vld [vmem:[#allocation5 + $0x1f0] sm:$0xff] }
  0xd3   :  { %v2242_v0 = vpack.c.bf16 %v207_v62, %v198_v61  ;;  %v917_v61 = vld [vmem:[#allocation8 + $0x1b8] sm:$0xff]  ;;  %v926_v62 = vld [vmem:[#allocation8 + $0x200] sm:$0xff] }
  0xd4   :  { %2215 = vmatpush1.bf16.msra.mxu1 %v2214_v3  ;;  %v2245_v3 = vpack.c.bf16 %v225_v2, %v216_v1  ;;  %v2342_v1 = vpack.c.bf16 %v911_v59, %v902_v58  ;;  %v2280_v2 = vpack.c.bf16 %v926_v62, %v917_v61  ;;  %v865_v59 = vld [vmem:[#allocation8 + $0x18] sm:$0xff]  ;;  %v870_v61 = vld [vmem:[#allocation8 + $0x40] sm:$0xff] }
  0xd5   :  { %2171 = vmatpush1.bf16.msra.mxu0 %v2170_v4  ;;  %2217 = vmatprep.subr.bf16.mxu1 %v2216_v5  ;;  %v243_v4 = vld [vmem:[#allocation5 + $0x358] sm:$0xff] }
  0xd6   :  { %2173 = vmatprep.subr.bf16.mxu0 %v2172_v9  ;;  %v270_v9 = vld [vmem:[#allocation5 + $0x430] sm:$0xff] }
  0xd7   :  { %v2254_v11 = vpack.c.bf16 %v279_v10, %v270_v9  ;;  %v944_v9 = vld [vmem:[#allocation8 + $0x290] sm:$0xff]  ;;  %v939_v10 = vld [vmem:[#allocation8 + $0x268] sm:$0xff] }
  0xd8   :  { %2219 = vmatpush1.bf16.msra.mxu1 %v2218_v16  ;;  %v306_v16 = vld [vmem:[#allocation5 + $0x550] sm:$0xff] }
  0xd9   :  { %2175 = vmatpush1.bf16.msra.mxu0 %v2174_v18  ;;  %2221 = vmatprep.subr.bf16.mxu1 %v2220_v19  ;;  %v315_v18 = vld [vmem:[#allocation5 + $0x598] sm:$0xff] }
  0xda   :  { %2177 = vmatprep.subr.bf16.mxu0 %v2176_v24  ;;  %v2260_v19 = vpack.c.bf16 %v315_v18, %v306_v16  ;;  %v342_v24 = vld [vmem:[#allocation5 + $0x670] sm:$0xff]  ;;  %v943_v18 = vld [vmem:[#allocation8 + $0x288] sm:$0xff] }
  0xdb   :  { %v2266_v26 = vpack.c.bf16 %v351_v25, %v342_v24  ;;  %v934_v16 = vld [vmem:[#allocation8 + $0x240] sm:$0xff]  ;;  %v957_v25 = vld [vmem:[#allocation8 + $0x2f8] sm:$0xff] }
  0xdc   :  { %2223 = vmatpush1.bf16.msra.mxu1 %v2222_v30  ;;  %v867_v30 = vld [vmem:[#allocation8 + $0x28] sm:$0xff]  ;;  %v962_v24 = vld [vmem:[#allocation8 + $0x320] sm:$0xff] }
  0xdd   :  { %2179 = vmatpush1.bf16.msra.mxu0 %v2178_v31  ;;  %2225 = vmatprep.subr.bf16.mxu1 %v2224_v32  ;;  %v2268_v31 = vpack.c.bf16 %v872_v29, %v863_v28  ;;  %v876_v32 = vld [vmem:[#allocation8 + $0x70] sm:$0xff] }
  0xde   :  { %2181 = vmatprep.subr.bf16.mxu0 %v2180_v36  ;;  %v2332_v35 = vpack.c.bf16 %v876_v32, %v867_v30  ;;  %v2270_v36 = vpack.c.bf16 %v871_v34, %v862_v33  ;;  %v952_v30 = vld [vmem:[#allocation8 + $0x2d0] sm:$0xff]  ;;  %v965_v34 = vld [vmem:[#allocation8 + $0x338] sm:$0xff] }
  0xdf   :  { %v956_v32 = vld [vmem:[#allocation8 + $0x2f0] sm:$0xff] }
  0xe0   :  { %2227 = vmatpush1.bf16.msra.mxu1 %v2226_v40  ;;  %v890_v40 = vld [vmem:[#allocation8 + $0xe0] sm:$0xff] }
  0xe1   :  { %2183 = vmatpush1.bf16.msra.mxu0 %v2182_v41  ;;  %2229 = vmatprep.subr.bf16.mxu1 %v2228_v42  ;;  %v894_v41 = vld [vmem:[#allocation8 + $0x100] sm:$0xff] }
  0xe2   :  { %1813 = vmatprep.subr.msk.mxu0 %vm417_vm1, %v357_v45  ;;  %v884_v45 = vld [vmem:[#allocation8 + $0xb0] sm:$0xff] }
  0xe4   :  { %2231 = vmatpush1.bf16.msra.mxu1 %v2230_v46  ;;  %v2274_v46 = vpack.c.bf16 %v889_v44, %v880_v43  ;;  %v983_v43 = vld [vmem:[#allocation8 + $0x3c8] sm:$0xff] }
  0xe5   :  { %1814 = vmatpush1.msk.msra.mxu0 %vm417_vm1, %v356_v50  ;;  %1817 = vmatprep.subr.msk.mxu1 %vm417_vm1, %v359_v51  ;;  %v908_v50 = vld [vmem:[#allocation8 + $0x170] sm:$0xff]  ;;  %v2338_v51 = vpack.c.bf16 %v893_v48, %v884_v45  ;;  %v998_v48 = vld [vmem:[#allocation8 + $0x440] sm:$0xff] }
  0xe6   :  { %664 = vmatmul.mubr.f32.vlgmr.msra.gmra.mrb[4].mxu0 %v2923_v23  ;;  %2232 = vmatprep.subr.bf16.mxu0 %v2747_v56 }
  0xe7   :  { %2234 = vmatpush1.bf16.msra.mxu0 %v2233_v52  ;;  %1816 = vmatprep.mubr.msk.f32.mxu0 %vm410_vm0, %v2931_v13  ;;  %v2276_v52 = vpack.c.bf16 %v908_v50, %v899_v49  ;;  %v993_v49 = vld [vmem:[#allocation8 + $0x418] sm:$0xff] }
  0xe8   :  { %1818 = vmatpush1.msk.msra.mxu1 %vm417_vm1, %v358_v55  ;;  %2235 = vmatprep.subr.bf16.mxu0 %v2747_v56  ;;  %v898_v55 = vld [vmem:[#allocation8 + $0x120] sm:$0xff] }
  0xe9   :  { %741 = vmatmul.mubr.f32.vlgmr.msra.gmra.mrb[4].mxu1 %v2923_v23  ;;  %2269 = vmatprep.subr.bf16.mxu1 %v2268_v31  ;;  %v961_v31 = vld [vmem:[#allocation8 + $0x318] sm:$0xff] }
  0xea   :  { %670 = vmatmul.mubr.f32.gmra.mrb[6].mxu0 %v2937_v17  ;;  %1820 = vmatprep.mubr.msk.f32.mxu1 %vm410_vm0, %v2931_v13 }
  0xeb   :  { %2237 = vmatpush1.bf16.msra.mxu0 %v2236_v57  ;;  %1822 = vmatprep.mubr.msk.f32.mxu0 %vm410_vm0, %v2917_v47  ;;  %v234_v47 = vld [vmem:[#allocation5 + $0x310] sm:$0xff]  ;;  %v907_v57 = vld [vmem:[#allocation8 + $0x168] sm:$0xff] }
  0xec   :  { %2238 = vmatprep.subr.bf16.mxu0 %v2747_v56  ;;  %v2248_v5 = vpack.c.bf16 %v243_v4, %v234_v47  ;;  %2271 = vmatpush1.bf16.msra.mxu1 %v2270_v36  ;;  %v916_v47 = vld [vmem:[#allocation8 + $0x1b0] sm:$0xff]  ;;  %v925_v4 = vld [vmem:[#allocation8 + $0x1f8] sm:$0xff] }
  0xed   :  { %747 = vmatmul.mubr.f32.gmra.mrb[6].mxu1 %v2937_v17  ;;  %v2282_v12 = vpack.c.bf16 %v925_v4, %v916_v47  ;;  %v980_v36 = vld [vmem:[#allocation8 + $0x3b0] sm:$0xff] }
  0xee   :  { %1119 = vmatprep.mubr.f32.mxu1 %v2748_v63  ;;  %v361_v4 = vld [vmem:[#allocation7] sm:$0xff] }
  0xef   :  { %2240 = vmatpush1.bf16.msra.mxu0 %v2239_v60  ;;  %v2278_v60 = vpack.c.bf16 %v907_v57, %v898_v55  ;;  %v1001_v57 = vld [vmem:[#allocation8 + $0x458] sm:$0xff] }
  0xf0   :  { %2241 = vmatprep.subr.bf16.mxu0 %v2747_v56 }
  0xf3   :  { %2243 = vmatpush1.bf16.msra.mxu0 %v2242_v0  ;;  %v921_v0 = vld [vmem:[#allocation8 + $0x1d8] sm:$0xff] }
  0xf4   :  { %2244 = vmatprep.subr.bf16.mxu0 %v2747_v56 }
  0xf7   :  { %2246 = vmatpush1.bf16.msra.mxu0 %v2245_v3  ;;  %v930_v3 = vld [vmem:[#allocation8 + $0x220] sm:$0xff] }
  0xf8   :  { %2247 = vmatprep.subr.bf16.mxu0 %v2747_v56 }
  0xfb   :  { %2249 = vmatpush1.bf16.msra.mxu0 %v2248_v5  ;;  %v2344_v5 = vpack.c.bf16 %v930_v3, %v921_v0  ;;  %v879_v0 = vld [vmem:[#allocation8 + $0x88] sm:$0xff] }
  0xfc   :  { %2250 = vmatprep.subr.bf16.mxu0 %v2747_v56 }
  0xff   :  { %2252 = vmatpush1.bf16.msra.mxu0 %v2251_v8  ;;  %v935_v8 = vld [vmem:[#allocation8 + $0x248] sm:$0xff] }
 0x100   :  { %2253 = vmatprep.subr.bf16.mxu0 %v2747_v56 }
 0x103   :  { %2255 = vmatpush1.bf16.msra.mxu0 %v2254_v11  ;;  %v948_v11 = vld [vmem:[#allocation8 + $0x2b0] sm:$0xff] }
 0x104   :  { %2256 = vmatprep.subr.bf16.mxu0 %v2747_v56  ;;  %v2348_v20 = vpack.c.bf16 %v948_v11, %v939_v10 }
 0x107   :  { %2258 = vmatpush1.bf16.msra.mxu0 %v2257_v15  ;;  %v2284_v15 = vpack.c.bf16 %v944_v9, %v935_v8 }
 0x108   :  { %2259 = vmatprep.subr.bf16.mxu0 %v2747_v56 }
 0x10b   :  { %2261 = vmatpush1.bf16.msra.mxu0 %v2260_v19  ;;  %v938_v19 = vld [vmem:[#allocation8 + $0x260] sm:$0xff] }
 0x10c   :  { %2262 = vmatprep.subr.bf16.mxu0 %v2747_v56  ;;  %v2350_v28 = vpack.c.bf16 %v947_v21, %v938_v19 }
 0x10f   :  { %2264 = vmatpush1.bf16.msra.mxu0 %v2263_v22  ;;  %v953_v22 = vld [vmem:[#allocation8 + $0x2d8] sm:$0xff] }
 0x110   :  { %2265 = vmatprep.subr.bf16.mxu0 %v2747_v56  ;;  %v2340_v56 = vpack.c.bf16 %v912_v54, %v903_v53  ;;  %v2288_v29 = vpack.c.bf16 %v962_v24, %v953_v22  ;;  %v997_v53 = vld [vmem:[#allocation8 + $0x438] sm:$0xff] }
 0x113   :  { %2267 = vmatpush1.bf16.msra.mxu0 %v2266_v26  ;;  %v966_v26 = vld [vmem:[#allocation8 + $0x340] sm:$0xff] }
 0x114   :  { %801 = vmatprep.subr.mxu0 %v2748_v63  ;;  %v2352_v33 = vpack.c.bf16 %v966_v26, %v957_v25 }
 0x117   :  { %1821 = vmatpush1.msk.msra.mxu0 %vm417_vm1, %v360_v27  ;;  %v2286_v27 = vpack.c.bf16 %v943_v18, %v934_v16 }
 0x118   :  { %818 = vmatmul.mubr.f32.vlgmr.msra.gmra.mrb[8].mxu0 %v2923_v23  ;;  %v2334_v23 = vpack.c.bf16 %v875_v38, %v866_v37  ;;  %2333 = vmatprep.subr.bf16.mxu0 %v2332_v35  ;;  %v971_v35 = vld [vmem:[#allocation8 + $0x368] sm:$0xff]  ;;  %v984_v38 = vld [vmem:[#allocation8 + $0x3d0] sm:$0xff] }
 0x119   :  { %1823 = vmatprep.mubr.msk.f32.mxu0 %vm410_vm0, %v2931_v13  ;;  %v885_v13 = vld [vmem:[#allocation8 + $0xb8] sm:$0xff]  ;;  %v975_v37 = vld [vmem:[#allocation8 + $0x388] sm:$0xff] }
 0x11a   :  { %v2336_v42 = vpack.c.bf16 %v894_v41, %v885_v13  ;;  %2335 = vmatpush1.bf16.msra.mxu0 %v2334_v23  ;;  %v2354_v23 = vpack.c.bf16 %v965_v34, %v956_v32  ;;  %v970_v13 = vld [vmem:[#allocation8 + $0x360] sm:$0xff]  ;;  %v979_v41 = vld [vmem:[#allocation8 + $0x3a8] sm:$0xff] }
 0x11b   :  { %v2294_v44 = vpack.c.bf16 %v979_v41, %v970_v13 }
 0x11c   :  { %823 = vmatmul.mubr.f32.gmra.mrb[10].mxu0 %v2937_v17  ;;  %v2272_v17 = vpack.c.bf16 %v890_v40, %v881_v39  ;;  %2337 = vmatprep.subr.bf16.mxu0 %v2336_v42  ;;  %v2290_v39 = vpack.c.bf16 %v961_v31, %v952_v30  ;;  %v2292_v40 = vpack.c.bf16 %v980_v36, %v971_v35  ;;  %v974_v42 = vld [vmem:[#allocation8 + $0x380] sm:$0xff] }
 0x11d   :  { %1273 = vmatprep.mubr.f32.mxu0 %v2748_v63  ;;  %v2358_v45 = vpack.c.bf16 %v983_v43, %v974_v42 }
 0x11e   :  { %2273 = vmatprep.subr.bf16.mxu1 %v2272_v17  ;;  %2339 = vmatpush1.bf16.msra.mxu0 %v2338_v51  ;;  %v2356_v17 = vpack.c.bf16 %v984_v38, %v975_v37  ;;  %v1002_v51 = vld [vmem:[#allocation8 + $0x460] sm:$0xff] }
 0x11f   :  { %2275 = vmatpush1.bf16.msra.mxu1 %v2274_v46  ;;  %2341 = vmatprep.subr.bf16.mxu0 %v2340_v56  ;;  %v989_v46 = vld [vmem:[#allocation8 + $0x3f8] sm:$0xff]  ;;  %v2360_v54 = vpack.c.bf16 %v1002_v51, %v993_v49  ;;  %v992_v56 = vld [vmem:[#allocation8 + $0x410] sm:$0xff] }
 0x120   :  { %2277 = vmatprep.subr.bf16.mxu1 %v2276_v52  ;;  %v2296_v50 = vpack.c.bf16 %v998_v48, %v989_v46  ;;  %v988_v52 = vld [vmem:[#allocation8 + $0x3f0] sm:$0xff]  ;;  %v2362_v58 = vpack.c.bf16 %v1001_v57, %v992_v56 }
 0x121   :  { %v2298_v55 = vpack.c.bf16 %v997_v53, %v988_v52 }
 0x122   :  { %2343 = vmatpush1.bf16.msra.mxu0 %v2342_v1  ;;  %v2979_v1 = vpack.c.bf16 %v879_v0, %v870_v61 }
 0x123   :  { %2279 = vmatpush1.bf16.msra.mxu1 %v2278_v60  ;;  %2345 = vmatprep.subr.bf16.mxu0 %v2344_v5  ;;  %v874_v60 = vld [vmem:[#allocation8 + $0x60] sm:$0xff] }
 0x124   :  { %2281 = vmatprep.subr.bf16.mxu1 %v2280_v2  ;;  %v2300_v62 = vpack.c.bf16 %v874_v60, %v865_v59  ;;  %v365_v2 = vlaneseq }
 0x126   :  { %2347 = vmatpush1.bf16.msra.mxu0 %v2346_v14  ;;  %v2982_v3 = vshrl.u32 %v365_v2, 7 }
 0x127   :  { %2283 = vmatpush1.bf16.msra.mxu1 %v2282_v12  ;;  %2349 = vmatprep.subr.bf16.mxu0 %v2348_v20 }
 0x128   :  { %2285 = vmatprep.subr.bf16.mxu1 %v2284_v15  ;;  %v367_v47 = vsub.s32 0, %v2982_v3  ;;  %v371_v5 = vsub.s32 1, %v2982_v3  ;;  %v375_v6 = vsub.s32 2, %v2982_v3  ;;  %v379_v7 = vsub.s32 3, %v2982_v3 }
 0x129   :  { %v383_v42 = vsub.s32 4, %v2982_v3  ;;  %v387_v43 = vsub.s32 5, %v2982_v3  ;;  %v395_v46 = vsub.s32 7, %v2982_v3 }
 0x12a   :  { %2351 = vmatpush1.bf16.msra.mxu0 %v2350_v28  ;;  %v368_v8 = vrot.slane %v361_v4, %v367_v47  ;;  %v372_v9 = vrot.slane %v361_v4, %v371_v5  ;;  %v376_v10 = vrot.slane %v361_v4, %v375_v6  ;;  %v380_v12 = vrot.slane %v361_v4, %v379_v7 }
 0x12b   :  { %2287 = vmatpush1.bf16.msra.mxu1 %v2286_v27  ;;  %2353 = vmatprep.subr.bf16.mxu0 %v2352_v33  ;;  %v388_v48 = vrot.slane %v361_v4, %v387_v43  ;;  %v396_v53 = vrot.slane %v361_v4, %v395_v46 }
 0x12c   :  { %2289 = vmatprep.subr.bf16.mxu1 %v2288_v29 }
 0x12e   :  { %2355 = vmatpush1.bf16.msra.mxu0 %v2354_v23 }
 0x12f   :  { %2291 = vmatpush1.bf16.msra.mxu1 %v2290_v39  ;;  %2357 = vmatprep.subr.bf16.mxu0 %v2356_v17 }
 0x130   :  { %2293 = vmatprep.subr.bf16.mxu1 %v2292_v40 }
 0x132   :  { %2359 = vmatpush1.bf16.msra.mxu0 %v2358_v45  ;;  %v384_v45 = vrot.slane %v361_v4, %v383_v42 }
 0x133   :  { %2295 = vmatpush1.bf16.msra.mxu1 %v2294_v44  ;;  %2361 = vmatprep.subr.bf16.mxu0 %v2360_v54  ;;  %v391_v44 = vsub.s32 6, %v2982_v3 }
 0x134   :  { %2297 = vmatprep.subr.bf16.mxu1 %v2296_v50 }
 0x135   :  { %v392_v50 = vrot.slane %v361_v4, %v391_v44 }
 0x136   :  { %2363 = vmatpush1.bf16.msra.mxu0 %v2362_v58 }
 0x137   :  { %2299 = vmatpush1.bf16.msra.mxu1 %v2298_v55  ;;  %2397 = vmatprep.subr.bf16.mxu0 %v2979_v1 }
 0x138   :  { %2301 = vmatprep.subr.bf16.mxu1 %v2300_v62 }
 0x187   :  { %v511_v11 = vpop.f32.mrb[0].mxu0 }
 0x188   :  { %v512_v14 = vadd.f32 %v511_v11, %v368_v8  ;;  %v513_v15 = vpop.f32.mrb[1].mxu0 }
 0x189   :  { %v514_v16 = vadd.f32 %v513_v15, %v372_v9  ;;  %v588_v18 = vpop.f32.mrb[0].mxu1 }
 0x18a   :  { %v828_v19 = vmax.f32 %v512_v14, 0.0  ;;  %v589_v20 = vadd.f32 %v588_v18, %v376_v10  ;;  %v590_v21 = vpop.f32.mrb[1].mxu1 }
 0x18b   :  { %v829_v22 = vmax.f32 %v514_v16, 0.0  ;;  %v591_v24 = vadd.f32 %v590_v21, %v380_v12 }
 0x18c   :  { %v830_v25 = vmax.f32 %v589_v20, 0.0 }
 0x18d   :  { %v846_v26 = vmax.f32 %v828_v19, %v829_v22  ;;  %v831_v27 = vmax.f32 %v591_v24, 0.0  ;;  %v517_v30 = vpop.f32.mrb[2].mxu0 }
 0x18e   :  { %v518_v31 = vadd.f32 %v517_v30, %v368_v8  ;;  %v519_v32 = vpop.f32.mrb[3].mxu0  ;;  %v594_v33 = vpop.f32.mrb[2].mxu1 }
 0x18f   :  { %v848_v28 = vmax.f32 %v846_v26, %v830_v25  ;;  %v520_v34 = vadd.f32 %v519_v32, %v372_v9  ;;  %v595_v35 = vadd.f32 %v594_v33, %v376_v10  ;;  %v596_v36 = vpop.f32.mrb[3].mxu1  ;;  %v864_v32 = vld [vmem:[#allocation8 + $0x10] sm:$0xff]  ;;  %v873_v33 = vld [vmem:[#allocation8 + $0x58] sm:$0xff] }
 0x190   :  { %v837_v37 = vmax.f32 %v518_v31, 0.0  ;;  %v597_v38 = vadd.f32 %v596_v36, %v380_v12 }
 0x191   :  { %v850_v29 = vmax.f32 %v848_v28, %v831_v27  ;;  %v838_v39 = vmax.f32 %v520_v34, 0.0  ;;  %v839_v23 = vmax.f32 %v595_v35, 0.0  ;;  %v1804_v28 = vld [vmem:[#allocation7 + $0x8] ss:$0 sm:$0xff]  ;;  %v883_v34 = vld [vmem:[#allocation8 + $0xa8] sm:$0xff]  ;;  %v892_v35 = vld [vmem:[#allocation8 + $0xf0] sm:$0xff] }
 0x192   :  { %v840_v13 = vmax.f32 %v597_v38, 0.0  ;;  %v897_v38 = vld [vmem:[#allocation8 + $0x118] sm:$0xff] }
 0x193   :  { %v847_v40 = vmax.f32 %v837_v37, %v838_v39  ;;  %v888_v37 = vld [vmem:[#allocation8 + $0xd0] sm:$0xff] }
 0x195   :  { %v849_v41 = vmax.f32 %v847_v40, %v839_v23  ;;  %v2302_v23 = vpack.c.bf16 %v873_v33, %v864_v32  ;;  %v973_v32 = vld [vmem:[#allocation8 + $0x378] sm:$0xff]  ;;  %v982_v33 = vld [vmem:[#allocation8 + $0x3c0] sm:$0xff] }
 0x197   :  { %v851_v17 = vmax.f32 %v849_v41, %v840_v13  ;;  %v2304_v41 = vpack.c.bf16 %v892_v35, %v883_v34  ;;  %v978_v34 = vld [vmem:[#allocation8 + $0x3a0] sm:$0xff]  ;;  %v987_v35 = vld [vmem:[#allocation8 + $0x3e8] sm:$0xff] }
 0x1b9   :  { %v665_v49 = vpop.f32.mrb[4].mxu0 }
 0x1ba   :  { %v666_v51 = vadd.f32 %v665_v49, %v384_v45  ;;  %v667_v52 = vpop.f32.mrb[5].mxu0  ;;  %v2400_v49 = vpack.c.bf16 %v897_v38, %v888_v37  ;;  %v2324_v37 = vpack.c.bf16 %v982_v33, %v973_v32  ;;  %v2420_v38 = vpack.c.bf16 %v987_v35, %v978_v34  ;;  %v958_v32 = vld [vmem:[#allocation8 + $0x300] sm:$0xff]  ;;  %v967_v33 = vld [vmem:[#allocation8 + $0x348] sm:$0xff]  ;;  %v977_v34 = vld [vmem:[#allocation8 + $0x398] sm:$0xff] }
 0x1bb   :  { %v668_v54 = vadd.f32 %v667_v52, %v388_v48  ;;  %v986_v35 = vld [vmem:[#allocation8 + $0x3e0] sm:$0xff] }
 0x1bc   :  { %v832_v55 = vmax.f32 %v666_v51, 0.0  ;;  %v742_v56 = vpop.f32.mrb[4].mxu1  ;;  %v910_v51 = vld [vmem:[#allocation8 + $0x180] sm:$0xff] }
 0x1bd   :  { %v833_v57 = vmax.f32 %v668_v54, 0.0  ;;  %v671_v58 = vpop.f32.mrb[6].mxu0  ;;  %v743_v59 = vadd.f32 %v742_v56, %v392_v50  ;;  %v744_v60 = vpop.f32.mrb[5].mxu1  ;;  %v915_v54 = vld [vmem:[#allocation8 + $0x1a8] sm:$0xff] }
 0x1be   :  { %v852_v61 = vmax.f32 %v850_v29, %v832_v55  ;;  %v672_v62 = vadd.f32 %v671_v58, %v384_v45  ;;  %v673_v0 = vpop.f32.mrb[7].mxu0  ;;  %v745_v2 = vadd.f32 %v744_v60, %v396_v53  ;;  %v891_v45 = vld [vmem:[#allocation8 + $0xe8] sm:$0xff]  ;;  %v900_v58 = vld [vmem:[#allocation8 + $0x130] sm:$0xff] }
 0x1bf   :  { %v834_v8 = vmax.f32 %v743_v59, 0.0  ;;  %v674_v9 = vadd.f32 %v673_v0, %v388_v48  ;;  %v909_v59 = vld [vmem:[#allocation8 + $0x178] sm:$0xff]  ;;  %v919_v60 = vld [vmem:[#allocation8 + $0x1c8] sm:$0xff]  ;;  %v924_v0 = vld [vmem:[#allocation8 + $0x1f0] sm:$0xff] }
 0x1c0   :  { %v854_v10 = vmax.f32 %v852_v61, %v833_v57  ;;  %v841_v11 = vmax.f32 %v672_v62, 0.0  ;;  %v835_v12 = vmax.f32 %v745_v2, 0.0  ;;  %v748_v14 = vpop.f32.mrb[6].mxu1  ;;  %v928_v62 = vld [vmem:[#allocation8 + $0x210] sm:$0xff]  ;;  %v933_v2 = vld [vmem:[#allocation8 + $0x238] sm:$0xff] }
 0x1c1   :  { %v842_v15 = vmax.f32 %v674_v9, 0.0  ;;  %v749_v16 = vadd.f32 %v748_v14, %v392_v50  ;;  %v750_v4 = vpop.f32.mrb[7].mxu1  ;;  %v901_v50 = vld [vmem:[#allocation8 + $0x138] sm:$0xff]  ;;  %v2408_v9 = vpack.c.bf16 %v933_v2, %v924_v0  ;;  %v946_v14 = vld [vmem:[#allocation8 + $0x2a0] sm:$0xff] }
 0x1c2   :  { %v853_v18 = vmax.f32 %v851_v17, %v841_v11  ;;  %v856_v19 = vmax.f32 %v854_v10, %v834_v8  ;;  %v751_v20 = vadd.f32 %v750_v4, %v396_v53  ;;  %v882_v17 = vld [vmem:[#allocation8 + $0xa0] sm:$0xff]  ;;  %v2308_v57 = vpack.c.bf16 %v910_v51, %v901_v50  ;;  %v927_v11 = vld [vmem:[#allocation8 + $0x208] sm:$0xff] }
 0x1c3   :  { %v843_v21 = vmax.f32 %v749_v16, 0.0  ;;  %v906_v53 = vld [vmem:[#allocation8 + $0x160] sm:$0xff]  ;;  %v2306_v55 = vpack.c.bf16 %v891_v45, %v882_v17  ;;  %v2312_v8 = vpack.c.bf16 %v928_v62, %v919_v60  ;;  %v951_v16 = vld [vmem:[#allocation8 + $0x2c8] sm:$0xff]  ;;  %v996_v17 = vld [vmem:[#allocation8 + $0x430] sm:$0xff] }
 0x1c4   :  { %v855_v22 = vmax.f32 %v853_v18, %v842_v15  ;;  %v858_v24 = vmax.f32 %v856_v19, %v835_v12  ;;  %v844_v25 = vmax.f32 %v751_v20, 0.0  ;;  %v2404_v61 = vpack.c.bf16 %v915_v54, %v906_v53  ;;  %v918_v10 = vld [vmem:[#allocation8 + $0x1c0] sm:$0xff]  ;;  %v937_v12 = vld [vmem:[#allocation8 + $0x258] sm:$0xff]  ;;  %v936_v20 = vld [vmem:[#allocation8 + $0x250] sm:$0xff] }
 0x1c5   :  { %v942_v15 = vld [vmem:[#allocation8 + $0x280] sm:$0xff]  ;;  %v2314_v4 = vpack.c.bf16 %v927_v11, %v918_v10  ;;  %v2316_v18 = vpack.c.bf16 %v946_v14, %v937_v12  ;;  %v1005_v45 = vld [vmem:[#allocation8 + $0x478] sm:$0xff]  ;;  %v887_v60 = vld [vmem:[#allocation8 + $0xc8] sm:$0xff] }
 0x1c6   :  { %v857_v26 = vmax.f32 %v855_v22, %v843_v21  ;;  %v2412_v19 = vpack.c.bf16 %v951_v16, %v942_v15  ;;  %v945_v21 = vld [vmem:[#allocation8 + $0x298] sm:$0xff]  ;;  %v955_v22 = vld [vmem:[#allocation8 + $0x2e8] sm:$0xff]  ;;  %v2424_v50 = vpack.c.bf16 %v1005_v45, %v996_v17  ;;  %v990_v51 = vld [vmem:[#allocation8 + $0x400] sm:$0xff] }
 0x1c7   :  { %v869_v53 = vld [vmem:[#allocation8 + $0x38] sm:$0xff]  ;;  %v878_v54 = vld [vmem:[#allocation8 + $0x80] sm:$0xff]  ;;  %v904_v12 = vld [vmem:[#allocation8 + $0x150] sm:$0xff] }
 0x1c8   :  { %v859_v27 = vmax.f32 %v857_v26, %v844_v25  ;;  %v960_v25 = vld [vmem:[#allocation8 + $0x310] sm:$0xff]  ;;  %v969_v26 = vld [vmem:[#allocation8 + $0x358] sm:$0xff]  ;;  %v886_v2 = vld [vmem:[#allocation8 + $0xc0] sm:$0xff] }
 0x1c9   :  { %v913_v14 = vld [vmem:[#allocation8 + $0x198] sm:$0xff]  ;;  %v923_v15 = vld [vmem:[#allocation8 + $0x1e8] sm:$0xff]  ;;  %v932_v16 = vld [vmem:[#allocation8 + $0x230] sm:$0xff] }
 0x1ca   :  { %v994_v45 = vld [vmem:[#allocation8 + $0x420] sm:$0xff] }
 0x1eb   :  { %v819_v29 = vpop.f32.mrb[8].mxu0 }
 0x1ec   :  { %v820_v30 = vadd.f32 %v1804_v28, %v819_v29  ;;  %v821_v31 = vpop.f32.mrb[9].mxu0  ;;  %v2416_v29 = vpack.c.bf16 %v969_v26, %v960_v25  ;;  %v940_v26 = vld [vmem:[#allocation8 + $0x270] sm:$0xff] }
 0x1ed   :  { %v963_v31 = vld [vmem:[#allocation8 + $0x328] sm:$0xff] }
 0x1ee   :  { %v836_v36 = vmax.f32 %v820_v30, 0.0  ;;  %v954_v30 = vld [vmem:[#allocation8 + $0x2e0] sm:$0xff] }
 0x1ef   :  { %v824_v39 = vpop.f32.mrb[10].mxu0 }
 0x1f0   :  { %v3008_v40 = vmax.f32 %v858_v24, %v836_v36  ;;  %v825_v13 = vadd.f32 %v1804_v28, %v824_v39  ;;  %v826_v48 = vpop.f32.mrb[11].mxu0  ;;  %v964_v24 = vld [vmem:[#allocation8 + $0x330] sm:$0xff]  ;;  %v2322_v36 = vpack.c.bf16 %v963_v31, %v954_v30 }
 0x1f1   :  { %v2320_v28 = vpack.c.bf16 %v964_v24, %v955_v22  ;;  %v972_v39 = vld [vmem:[#allocation8 + $0x370] sm:$0xff]  ;;  %v950_v22 = vld [vmem:[#allocation8 + $0x2c0] sm:$0xff] }
 0x1f2   :  { %v845_v52 = vmax.f32 %v825_v13, 0.0  ;;  %1120 = vmatmul.mubr.f32.vlgmr.msra.gmra.mrb[8].mxu1 %v3008_v40  ;;  %1274 = vmatmul.mubr.f32.vlgmr.msra.gmra.mrb[12].mxu0 %v3008_v40  ;;  %v991_v13 = vld [vmem:[#allocation8 + $0x408] sm:$0xff] }
 0x1f3   :  { %2303 = vmatpush1.bf16.msra.mxu1 %v2302_v23  ;;  %2399 = vmatpush3.bf16.msra.mxu0 %v2979_v1  ;;  %v2310_v1 = vpack.c.bf16 %v909_v59, %v900_v58  ;;  %v981_v23 = vld [vmem:[#allocation8 + $0x3b8] sm:$0xff]  ;;  %v868_v58 = vld [vmem:[#allocation8 + $0x30] sm:$0xff] }
 0x1f4   :  { %v3013_v56 = vmax.f32 %v859_v27, %v845_v52  ;;  %1125 = vmatprep.mubr.f32.mxu1 %v2748_v63  ;;  %2305 = vmatprep.subr.bf16.mxu1 %v2304_v41  ;;  %v2318_v27 = vpack.c.bf16 %v945_v21, %v936_v20  ;;  %v1000_v41 = vld [vmem:[#allocation8 + $0x450] sm:$0xff]  ;;  %v2326_v48 = vpack.c.bf16 %v981_v23, %v972_v39  ;;  %v999_v52 = vld [vmem:[#allocation8 + $0x448] sm:$0xff]  ;;  %v877_v59 = vld [vmem:[#allocation8 + $0x78] sm:$0xff] }
 0x1f5   :  { %1279 = vmatprep.mubr.f32.mxu0 %v2748_v63  ;;  %2401 = vmatprep.subr.bf16.mxu0 %v2400_v49  ;;  %v2366_v62 = vpack.c.bf16 %v877_v59, %v868_v58  ;;  %v931_v20 = vld [vmem:[#allocation8 + $0x228] sm:$0xff]  ;;  %v941_v21 = vld [vmem:[#allocation8 + $0x278] sm:$0xff] }
 0x1f6   :  { %1126 = vmatmul.mubr.f32.gmra.mrb[10].mxu1 %v3013_v56  ;;  %1280 = vmatmul.mubr.f32.gmra.mrb[14].mxu0 %v3013_v56  ;;  %v2380_v25 = vpack.c.bf16 %v950_v22, %v941_v21  ;;  %v985_v39 = vld [vmem:[#allocation8 + $0x3d8] sm:$0xff]  ;;  %v995_v23 = vld [vmem:[#allocation8 + $0x428] sm:$0xff]  ;;  %v1576_v21 = vld [vmem:[#allocation11 + $0x20] sm:$0xff] }
 0x1f7   :  { %2307 = vmatpush1.bf16.msra.mxu1 %v2306_v55  ;;  %2403 = vmatpush3.bf16.msra.mxu0 %v2400_v49  ;;  %v2328_v49 = vpack.c.bf16 %v1000_v41, %v991_v13  ;;  %v2330_v55 = vpack.c.bf16 %v999_v52, %v990_v51  ;;  %v1004_v13 = vld [vmem:[#allocation8 + $0x470] sm:$0xff]  ;;  %v1473_v51 = vld [vmem:[#allocation10 + $0x8] sm:$0xff] }
 0x1f8   :  { %1932 = vmatprep.mubr.f32.mxu0 %v3008_v40  ;;  %2309 = vmatprep.subr.bf16.mxu1 %v2308_v57  ;;  %v2364_v57 = vpack.c.bf16 %v878_v54, %v869_v53  ;;  %v2392_v17 = vpack.c.bf16 %v1004_v13, %v995_v23  ;;  %v1474_v53 = vld [vmem:[#allocation10 + $0x10] sm:$0xff]  ;;  %v1475_v54 = vld [vmem:[#allocation10 + $0x18] sm:$0xff]  ;;  %v1477_v58 = vld [vmem:[#allocation10 + $0x28] sm:$0xff] }
 0x1f9   :  { %2405 = vmatprep.subr.bf16.mxu0 %v2404_v61  ;;  %1196 = vmatprep.mubr.f32.mxu1 %v2748_v63  ;;  %v1577_v22 = vld [vmem:[#allocation11 + $0x28] sm:$0xff] }
 0x1fb   :  { %2311 = vmatpush1.bf16.msra.mxu1 %v2310_v1  ;;  %2407 = vmatpush3.bf16.msra.mxu0 %v2404_v61  ;;  %v896_v61 = vld [vmem:[#allocation8 + $0x110] sm:$0xff]  ;;  %v895_v1 = vld [vmem:[#allocation8 + $0x108] sm:$0xff] }
 0x1fc   :  { %2313 = vmatprep.subr.bf16.mxu1 %v2312_v8  ;;  %2409 = vmatprep.subr.bf16.mxu0 %v2408_v9  ;;  %v2368_v0 = vpack.c.bf16 %v896_v61, %v887_v60  ;;  %v905_v8 = vld [vmem:[#allocation8 + $0x158] sm:$0xff]  ;;  %v2370_v10 = vpack.c.bf16 %v895_v1, %v886_v2  ;;  %v1478_v60 = vld [vmem:[#allocation10 + $0x30] sm:$0xff] }
 0x1fd   :  { %v1479_v61 = vld [vmem:[#allocation10 + $0x38] sm:$0xff] }
 0x1fe   :  { %v1483_v2 = vld [vmem:[#allocation10 + $0x58] sm:$0xff] }
 0x1ff   :  { %2315 = vmatpush1.bf16.msra.mxu1 %v2314_v4  ;;  %2411 = vmatpush3.bf16.msra.mxu0 %v2408_v9  ;;  %v914_v9 = vld [vmem:[#allocation8 + $0x1a0] sm:$0xff]  ;;  %v2374_v4 = vpack.c.bf16 %v913_v14, %v904_v12  ;;  %v1487_v12 = vld [vmem:[#allocation10 + $0x78] sm:$0xff] }
 0x200   :  { %2317 = vmatprep.subr.bf16.mxu1 %v2316_v18  ;;  %2413 = vmatprep.subr.bf16.mxu0 %v2412_v19  ;;  %v2372_v11 = vpack.c.bf16 %v914_v9, %v905_v8  ;;  %v2376_v18 = vpack.c.bf16 %v932_v16, %v923_v15  ;;  %v1484_v8 = vld [vmem:[#allocation10 + $0x60] sm:$0xff]  ;;  %v1485_v9 = vld [vmem:[#allocation10 + $0x68] sm:$0xff] }
 0x201   :  { %v1572_v15 = vld [vmem:[#allocation11] sm:$0xff]  ;;  %v1573_v16 = vld [vmem:[#allocation11 + $0x8] sm:$0xff] }
 0x203   :  { %2319 = vmatpush1.bf16.msra.mxu1 %v2318_v27  ;;  %2415 = vmatpush3.bf16.msra.mxu0 %v2412_v19  ;;  %v922_v19 = vld [vmem:[#allocation8 + $0x1e0] sm:$0xff]  ;;  %v949_v27 = vld [vmem:[#allocation8 + $0x2b8] sm:$0xff] }
 0x204   :  { %2321 = vmatprep.subr.bf16.mxu1 %v2320_v28  ;;  %2417 = vmatprep.subr.bf16.mxu0 %v2416_v29  ;;  %v2378_v24 = vpack.c.bf16 %v931_v20, %v922_v19  ;;  %v959_v28 = vld [vmem:[#allocation8 + $0x308] sm:$0xff]  ;;  %v2382_v30 = vpack.c.bf16 %v949_v27, %v940_v26  ;;  %v1575_v19 = vld [vmem:[#allocation11 + $0x18] sm:$0xff] }
 0x205   :  { %v1579_v26 = vld [vmem:[#allocation11 + $0x38] sm:$0xff] }
 0x207   :  { %2323 = vmatpush1.bf16.msra.mxu1 %v2322_v36  ;;  %2419 = vmatpush3.bf16.msra.mxu0 %v2416_v29  ;;  %v968_v29 = vld [vmem:[#allocation8 + $0x350] sm:$0xff]  ;;  %v2386_v36 = vpack.c.bf16 %v967_v33, %v958_v32  ;;  %v1583_v32 = vld [vmem:[#allocation11 + $0x58] sm:$0xff] }
 0x208   :  { %2325 = vmatprep.subr.bf16.mxu1 %v2324_v37  ;;  %2421 = vmatprep.subr.bf16.mxu0 %v2420_v38  ;;  %v2384_v31 = vpack.c.bf16 %v968_v29, %v959_v28  ;;  %v2388_v37 = vpack.c.bf16 %v986_v35, %v977_v34  ;;  %v1580_v28 = vld [vmem:[#allocation11 + $0x40] sm:$0xff]  ;;  %v1581_v29 = vld [vmem:[#allocation11 + $0x48] sm:$0xff] }
 0x209   :  { %v1584_v34 = vld [vmem:[#allocation11 + $0x60] sm:$0xff]  ;;  %v1585_v35 = vld [vmem:[#allocation11 + $0x68] sm:$0xff] }
 0x20b   :  { %2327 = vmatpush1.bf16.msra.mxu1 %v2326_v48  ;;  %2423 = vmatpush3.bf16.msra.mxu0 %v2420_v38  ;;  %v976_v38 = vld [vmem:[#allocation8 + $0x390] sm:$0xff]  ;;  %v1003_v48 = vld [vmem:[#allocation8 + $0x468] sm:$0xff] }
 0x20c   :  { %2329 = vmatprep.subr.bf16.mxu1 %v2328_v49  ;;  %2425 = vmatprep.subr.bf16.mxu0 %v2424_v50  ;;  %v2390_v41 = vpack.c.bf16 %v985_v39, %v976_v38  ;;  %v2394_v49 = vpack.c.bf16 %v1003_v48, %v994_v45 }
 0x20f   :  { %2331 = vmatpush1.bf16.msra.mxu1 %v2330_v55  ;;  %2427 = vmatpush3.bf16.msra.mxu0 %v2424_v50  ;;  %v1472_v50 = vld [vmem:[#allocation10] sm:$0xff]  ;;  %v2432_v55 = vpack.c.bf16 %v1475_v54, %v1474_v53 }
 0x210   :  { %2365 = vmatprep.subr.bf16.mxu1 %v2364_v57  ;;  %v2428_v52 = vpack.c.bf16 %v1473_v51, %v1472_v50  ;;  %v1476_v57 = vld [vmem:[#allocation10 + $0x20] sm:$0xff] }
 0x211   :  { %v2436_v59 = vpack.c.bf16 %v1477_v58, %v1476_v57 }
 0x212   :  { %1197 = vmatmul.mubr.f32.vlgmr.msra.gmra.mrb[12].mxu1 %v3008_v40  ;;  %1933 = vmatmul.mubr.f32.vlgmr.msra.gmra.mrb[16].mxu0 %v3013_v56 }
 0x213   :  { %2367 = vmatpush1.bf16.msra.mxu1 %v2366_v62  ;;  %1202 = vmatprep.mubr.f32.mxu1 %v2748_v63  ;;  %v1481_v62 = vld [vmem:[#allocation10 + $0x48] sm:$0xff] }
 0x214   :  { %2369 = vmatprep.subr.bf16.mxu1 %v2368_v0  ;;  %v1482_v0 = vld [vmem:[#allocation10 + $0x50] sm:$0xff] }
 0x215   :  { %v2448_v1 = vpack.c.bf16 %v1483_v2, %v1482_v0 }
 0x216   :  { %1203 = vmatmul.mubr.f32.gmra.mrb[14].mxu1 %v3013_v56 }
 0x217   :  { %2371 = vmatpush1.bf16.msra.mxu1 %v2370_v10  ;;  %1350 = vmatprep.mubr.f32.mxu1 %v2748_v63  ;;  %v2452_v10 = vpack.c.bf16 %v1485_v9, %v1484_v8 }
 0x218   :  { %2373 = vmatprep.subr.bf16.mxu1 %v2372_v11  ;;  %v1486_v11 = vld [vmem:[#allocation10 + $0x70] sm:$0xff] }
 0x219   :  { %v2456_v14 = vpack.c.bf16 %v1487_v12, %v1486_v11 }
 0x21b   :  { %2375 = vmatpush1.bf16.msra.mxu1 %v2374_v4  ;;  %v1574_v4 = vld [vmem:[#allocation11 + $0x10] sm:$0xff] }
 0x21c   :  { %2377 = vmatprep.subr.bf16.mxu1 %v2376_v18  ;;  %v2460_v18 = vpack.c.bf16 %v1573_v16, %v1572_v15  ;;  %v2464_v20 = vpack.c.bf16 %v1575_v19, %v1574_v4 }
 0x21e   :  { %2461 = vmatprep.subr.bf16.mxu0 %v2460_v18 }
 0x21f   :  { %2379 = vmatpush1.bf16.msra.mxu1 %v2378_v24  ;;  %2463 = vmatpush3.bf16.msra.mxu0 %v2460_v18  ;;  %v2468_v24 = vpack.c.bf16 %v1577_v22, %v1576_v21 }
 0x220   :  { %2381 = vmatprep.subr.bf16.mxu1 %v2380_v25  ;;  %2465 = vmatprep.subr.bf16.mxu0 %v2464_v20  ;;  %v1578_v25 = vld [vmem:[#allocation11 + $0x30] sm:$0xff] }
 0x221   :  { %v2472_v27 = vpack.c.bf16 %v1579_v26, %v1578_v25 }
 0x223   :  { %2383 = vmatpush1.bf16.msra.mxu1 %v2382_v30  ;;  %2467 = vmatpush3.bf16.msra.mxu0 %v2464_v20  ;;  %v2476_v30 = vpack.c.bf16 %v1581_v29, %v1580_v28 }
 0x224   :  { %2385 = vmatprep.subr.bf16.mxu1 %v2384_v31  ;;  %2469 = vmatprep.subr.bf16.mxu0 %v2468_v24  ;;  %v1582_v31 = vld [vmem:[#allocation11 + $0x50] sm:$0xff] }
 0x225   :  { %v2480_v33 = vpack.c.bf16 %v1583_v32, %v1582_v31 }
 0x227   :  { %2387 = vmatpush1.bf16.msra.mxu1 %v2386_v36  ;;  %2471 = vmatpush3.bf16.msra.mxu0 %v2468_v24  ;;  %v2484_v36 = vpack.c.bf16 %v1585_v35, %v1584_v34 }
 0x228   :  { %2389 = vmatprep.subr.bf16.mxu1 %v2388_v37  ;;  %2473 = vmatprep.subr.bf16.mxu0 %v2472_v27  ;;  %v1006_v37 = vld [vmem:[%s3079_s4] sm:$0xff] }
 0x229   :  { %v1013_v38 = vrot.slane %v1006_v37, %v367_v47  ;;  %v1017_v39 = vrot.slane %v1006_v37, %v371_v5  ;;  %v1021_v5 = vrot.slane %v1006_v37, %v375_v6  ;;  %v1037_v31 = vrot.slane %v1006_v37, %v391_v44 }
 0x22a   :  { %v1041_v32 = vrot.slane %v1006_v37, %v395_v46 }
 0x22b   :  { %2391 = vmatpush1.bf16.msra.mxu1 %v2390_v41  ;;  %2475 = vmatpush3.bf16.msra.mxu0 %v2472_v27 }
 0x22c   :  { %2393 = vmatprep.subr.bf16.mxu1 %v2392_v17  ;;  %2477 = vmatprep.subr.bf16.mxu0 %v2476_v30 }
 0x22f   :  { %2395 = vmatpush1.bf16.msra.mxu1 %v2394_v49  ;;  %2479 = vmatpush3.bf16.msra.mxu0 %v2476_v30 }
 0x230   :  { %2429 = vmatprep.subr.bf16.mxu1 %v2428_v52  ;;  %2481 = vmatprep.subr.bf16.mxu0 %v2480_v33 }
 0x232   :  { %1351 = vmatmul.mubr.f32.vlgmr.msra.gmra.mrb[16].mxu1 %v3008_v40  ;;  %v2440_v40 = vpack.c.bf16 %v1479_v61, %v1478_v60  ;;  %v1025_v61 = vrot.slane %v1006_v37, %v379_v7 }
 0x233   :  { %1356 = vmatprep.mubr.f32.mxu1 %v2748_v63  ;;  %2431 = vmatpush3.bf16.msra.mxu1 %v2428_v52  ;;  %v1480_v63 = vld [vmem:[#allocation10 + $0x40] sm:$0xff] }
 0x234   :  { %2433 = vmatprep.subr.bf16.mxu1 %v2432_v55  ;;  %2483 = vmatpush3.bf16.msra.mxu0 %v2480_v33  ;;  %v1824_v33 = vld [vmem:[%s3079_s4 + $0x8] ss:$0 sm:$0xff] }
 0x235   :  { %2485 = vmatprep.subr.bf16.mxu0 %v2484_v36 }
 0x236   :  { %1357 = vmatmul.mubr.f32.gmra.mrb[18].mxu1 %v3013_v56  ;;  %v2444_v56 = vpack.c.bf16 %v1481_v62, %v1480_v63 }
 0x237   :  { %2435 = vmatpush3.bf16.msra.mxu1 %v2432_v55 }
 0x238   :  { %2437 = vmatprep.subr.bf16.mxu1 %v2436_v59  ;;  %2487 = vmatpush3.bf16.msra.mxu0 %v2484_v36 }
 0x23b   :  { %2439 = vmatpush3.bf16.msra.mxu1 %v2436_v59 }
 0x23c   :  { %2441 = vmatprep.subr.bf16.mxu1 %v2440_v40 }
 0x23f   :  { %2443 = vmatpush3.bf16.msra.mxu1 %v2440_v40  ;;  %v1029_v40 = vrot.slane %v1006_v37, %v383_v42 }
 0x240   :  { %2445 = vmatprep.subr.bf16.mxu1 %v2444_v56 }
 0x243   :  { %2447 = vmatpush3.bf16.msra.mxu1 %v2444_v56  ;;  %v1033_v56 = vrot.slane %v1006_v37, %v387_v43 }
 0x244   :  { %2449 = vmatprep.subr.bf16.mxu1 %v2448_v1 }
 0x247   :  { %2451 = vmatpush3.bf16.msra.mxu1 %v2448_v1 }
 0x248   :  { %2453 = vmatprep.subr.bf16.mxu1 %v2452_v10 }
 0x24b   :  { %2455 = vmatpush3.bf16.msra.mxu1 %v2452_v10 }
 0x24c   :  { %2457 = vmatprep.subr.bf16.mxu1 %v2456_v14 }
 0x24f   :  { %2459 = vmatpush3.bf16.msra.mxu1 %v2456_v14 }
 0x2c5   :  { %v1121_v23 = vpop.f32.mrb[8].mxu1  ;;  %v1275_v13 = vpop.f32.mrb[12].mxu0 }
 0x2c6   :  { %v1122_v41 = vadd.f32 %v1121_v23, %v1013_v38  ;;  %v1123_v17 = vpop.f32.mrb[9].mxu1  ;;  %v1277_v45 = vpop.f32.mrb[13].mxu0  ;;  %v1276_v9 = vadd.f32 %v1275_v13, %v1029_v40 }
 0x2c7   :  { %v1124_v48 = vadd.f32 %v1123_v17, %v1017_v39  ;;  %v1278_v6 = vadd.f32 %v1277_v45, %v1033_v56 }
 0x2c8   :  { %v1438_v49 = vmax.f32 %v1122_v41, 0.0  ;;  %v1442_v4 = vmax.f32 %v1276_v9, 0.0  ;;  %v1680_v9 = vld [vmem:[#allocation13 + $0x40] sm:$0xff] }
 0x2c9   :  { %v1439_v50 = vmax.f32 %v1124_v48, 0.0  ;;  %v1127_v51 = vpop.f32.mrb[10].mxu1  ;;  %v1281_v52 = vpop.f32.mrb[14].mxu0  ;;  %v1443_v21 = vmax.f32 %v1278_v6, 0.0  ;;  %v1683_v6 = vld [vmem:[#allocation13 + $0x58] sm:$0xff] }
 0x2ca   :  { %v1128_v53 = vadd.f32 %v1127_v51, %v1013_v38  ;;  %v1129_v54 = vpop.f32.mrb[11].mxu1  ;;  %v1283_v55 = vpop.f32.mrb[15].mxu0  ;;  %v1282_v42 = vadd.f32 %v1281_v52, %v1029_v40  ;;  %v1675_v40 = vld [vmem:[#allocation13 + $0x18] sm:$0xff] }
 0x2cb   :  { %v1456_v57 = vmax.f32 %v1438_v49, %v1439_v50  ;;  %v1130_v58 = vadd.f32 %v1129_v54, %v1017_v39  ;;  %v1284_v43 = vadd.f32 %v1283_v55, %v1033_v56  ;;  %v1677_v56 = vld [vmem:[#allocation13 + $0x28] sm:$0xff] }
 0x2cc   :  { %v1447_v59 = vmax.f32 %v1128_v53, 0.0  ;;  %v1451_v25 = vmax.f32 %v1282_v42, 0.0 }
 0x2cd   :  { %v1448_v47 = vmax.f32 %v1130_v58, 0.0  ;;  %v1452_v28 = vmax.f32 %v1284_v43, 0.0  ;;  %v1587_v58 = vld [vmem:[#allocation11 + $0x78] sm:$0xff] }
 0x2cf   :  { %v1457_v60 = vmax.f32 %v1447_v59, %v1448_v47  ;;  %v1672_v47 = vld [vmem:[#allocation13] sm:$0xff] }
 0x2e5   :  { %v1198_v63 = vpop.f32.mrb[12].mxu1  ;;  %v1934_v62 = vpop.f32.mrb[16].mxu0 }
 0x2e6   :  { %v1199_v0 = vadd.f32 %v1198_v63, %v1021_v5  ;;  %v1200_v2 = vpop.f32.mrb[13].mxu1  ;;  %v1429_v1 = vpop.f32.mrb[17].mxu0  ;;  %v1435_v44 = vadd.f32 %v1934_v62, %v1824_v33  ;;  %v1676_v62 = vld [vmem:[#allocation13 + $0x20] sm:$0xff] }
 0x2e7   :  { %v1201_v8 = vadd.f32 %v1200_v2, %v1025_v61  ;;  %v1430_v39 = vadd.f32 %v1824_v33, %v1429_v1  ;;  %v1678_v2 = vld [vmem:[#allocation13 + $0x30] sm:$0xff]  ;;  %v1679_v1 = vld [vmem:[#allocation13 + $0x38] sm:$0xff]  ;;  %v1827_v33 = vld [vmem:[%s3085_s10] ss:$0 sm:$0xff] }
 0x2e8   :  { %v1440_v10 = vmax.f32 %v1199_v0, 0.0  ;;  %v1455_v53 = vmax.f32 %v1435_v44, 0.0  ;;  %v2500_v0 = vpack.c.bf16 %v1677_v56, %v1676_v62 }
 0x2e9   :  { %v1441_v11 = vmax.f32 %v1201_v8, 0.0  ;;  %v1204_v12 = vpop.f32.mrb[14].mxu1  ;;  %v1446_v50 = vmax.f32 %v1430_v39, 0.0  ;;  %v2504_v8 = vpack.c.bf16 %v1679_v1, %v1678_v2 }
 0x2ea   :  { %v1458_v14 = vmax.f32 %v1456_v57, %v1440_v10  ;;  %v1205_v15 = vadd.f32 %v1204_v12, %v1021_v5  ;;  %v1206_v7 = vpop.f32.mrb[15].mxu1  ;;  %v1586_v57 = vld [vmem:[#allocation11 + $0x70] sm:$0xff]  ;;  %v1681_v10 = vld [vmem:[#allocation13 + $0x48] sm:$0xff] }
 0x2eb   :  { %v1207_v16 = vadd.f32 %v1206_v7, %v1025_v61  ;;  %v2488_v59 = vpack.c.bf16 %v1587_v58, %v1586_v57  ;;  %v1674_v5 = vld [vmem:[#allocation13 + $0x10] sm:$0xff]  ;;  %v1685_v7 = vld [vmem:[#allocation13 + $0x68] sm:$0xff] }
 0x2ec   :  { %v1460_v18 = vmax.f32 %v1458_v14, %v1441_v11  ;;  %v1449_v19 = vmax.f32 %v1205_v15, 0.0  ;;  %v2496_v63 = vpack.c.bf16 %v1675_v40, %v1674_v5  ;;  %v2508_v11 = vpack.c.bf16 %v1681_v10, %v1680_v9  ;;  %v1682_v12 = vld [vmem:[#allocation13 + $0x50] sm:$0xff]  ;;  %v1684_v15 = vld [vmem:[#allocation13 + $0x60] sm:$0xff] }
 0x2ed   :  { %v1450_v20 = vmax.f32 %v1207_v16, 0.0  ;;  %2489 = vmatprep.subr.bf16.mxu0 %v2488_v59  ;;  %v2512_v14 = vpack.c.bf16 %v1683_v6, %v1682_v12  ;;  %v2516_v16 = vpack.c.bf16 %v1685_v7, %v1684_v15 }
 0x2ee   :  { %v1462_v22 = vmax.f32 %v1460_v18, %v1442_v4  ;;  %v1459_v24 = vmax.f32 %v1457_v60, %v1449_v19  ;;  %2491 = vmatpush3.bf16.msra.mxu0 %v2488_v59  ;;  %v1673_v60 = vld [vmem:[#allocation13 + $0x8] sm:$0xff] }
 0x2ef   :  { %v2492_v61 = vpack.c.bf16 %v1673_v60, %v1672_v47  ;;  %v1825_v4 = vld [vmem:[%s3081_s6] ss:$0 sm:$0xff] }
 0x2f0   :  { %v1461_v26 = vmax.f32 %v1459_v24, %v1450_v20  ;;  %v1464_v27 = vmax.f32 %v1462_v22, %v1443_v21  ;;  %v1686_v22 = vld [vmem:[#allocation13 + $0x70] sm:$0xff]  ;;  %v1687_v24 = vld [vmem:[#allocation13 + $0x78] sm:$0xff] }
 0x2f1   :  { %2493 = vmatprep.subr.bf16.mxu1 %v2492_v61 }
 0x2f2   :  { %v1463_v29 = vmax.f32 %v1461_v26, %v1451_v25  ;;  %v2520_v25 = vpack.c.bf16 %v1687_v24, %v1686_v22  ;;  %v1826_v26 = vld [vmem:[%s3083_s8] ss:$0 sm:$0xff]  ;;  %s2749_s8 = smov [#allocation14]  }
 0x2f3   :  { %s1789_s14 = sshll.u32 %s2749_s8, 4  ;;  %s1790_s14 = int_to_ptr.vmem [resolvable:$true] %s1789_s14 }
 0x2f4   :  { %v1465_v30 = vmax.f32 %v1463_v29, %v1452_v28  ;;  %s2702_s10 = scalar_lea.vmem %s1790_s14, 256  ;;  %p2707_p1 = scmp.lt.s32.totalorder %s1790_s14, %s1790_s14 }
 0x2f5   :  { %p2703_p0 = scmp.ne.s32.totalorder %s1790_s14, %s2702_s10  ;;  %p2708_p2 = scmp.lt.s32.totalorder %s2702_s10, %s2702_s10 }
 0x2f7   :  { %p2709_p3 = por %p2708_p2, %p2707_p1 }
 0x2f9   :  { %p2710_p4 = pnand %p2709_p3, %p2703_p0 }
 0x305   :  { %v1352_v34 = vpop.f32.mrb[16].mxu1 }
 0x306   :  { %v1353_v35 = vadd.f32 %v1352_v34, %v1037_v31  ;;  %v1354_v36 = vpop.f32.mrb[17].mxu1 }
 0x307   :  { %v1355_v38 = vadd.f32 %v1354_v36, %v1041_v32 }
 0x308   :  { %v1444_v23 = vmax.f32 %v1353_v35, 0.0 }
 0x309   :  { %v1445_v13 = vmax.f32 %v1355_v38, 0.0  ;;  %v1358_v41 = vpop.f32.mrb[18].mxu1 }
 0x30a   :  { %v1466_v17 = vmax.f32 %v1464_v27, %v1444_v23  ;;  %v1359_v45 = vadd.f32 %v1358_v41, %v1037_v31  ;;  %v1360_v48 = vpop.f32.mrb[19].mxu1 }
 0x30b   :  { %v1361_v49 = vadd.f32 %v1360_v48, %v1041_v32 }
 0x30c   :  { %v1468_v3 = vmax.f32 %v1466_v17, %v1445_v13  ;;  %v1453_v46 = vmax.f32 %v1359_v45, 0.0 }
 0x30d   :  { %v1454_v37 = vmax.f32 %v1361_v49, 0.0 }
 0x30e   :  { %v1467_v51 = vmax.f32 %v1465_v30, %v1453_v46  ;;  %v1470_v52 = vmax.f32 %v1468_v3, %v1446_v50 }
 0x310   :  { %v1469_v54 = vmax.f32 %v1467_v51, %v1454_v37  ;;  %1967 = vmatprep.mubr.f32.mxu1 %v1470_v52 }
 0x312   :  { %v1471_v55 = vmax.f32 %v1469_v54, %v1455_v53 }
 0x314   :  { %1968 = vmatmul.mubr.f32.vlgmr.msra.gmra.mrb[20].mxu1 %v1471_v55 }
 0x315   :  { %2495 = vmatpush3.bf16.msra.mxu1 %v2492_v61 }
 0x316   :  { %2497 = vmatprep.subr.bf16.mxu1 %v2496_v63 }
 0x319   :  { %2499 = vmatpush3.bf16.msra.mxu1 %v2496_v63 }
 0x31a   :  { %2501 = vmatprep.subr.bf16.mxu1 %v2500_v0 }
 0x31d   :  { %2503 = vmatpush3.bf16.msra.mxu1 %v2500_v0 }
 0x31e   :  { %2505 = vmatprep.subr.bf16.mxu1 %v2504_v8 }
 0x321   :  { %2507 = vmatpush3.bf16.msra.mxu1 %v2504_v8 }
 0x322   :  { %2509 = vmatprep.subr.bf16.mxu1 %v2508_v11 }
 0x325   :  { %2511 = vmatpush3.bf16.msra.mxu1 %v2508_v11 }
 0x326   :  { %2513 = vmatprep.subr.bf16.mxu1 %v2512_v14 }
 0x329   :  { %2515 = vmatpush3.bf16.msra.mxu1 %v2512_v14 }
 0x32a   :  { %2517 = vmatprep.subr.bf16.mxu1 %v2516_v16 }
 0x32d   :  { %2519 = vmatpush3.bf16.msra.mxu1 %v2516_v16 }
 0x32e   :  { %2521 = vmatprep.subr.bf16.mxu1 %v2520_v25 }
 0x331   :  { %2523 = vmatpush3.bf16.msra.mxu1 %v2520_v25 }
 0x3e7   :  { %v1969_v42 = vpop.f32.mrb[20].mxu1 }
 0x3e8   :  { %v1567_v18 = vadd.f32 %v1969_v42, %v1825_v4  ;;  %v1561_v19 = vpop.f32.mrb[21].mxu1 }
 0x3e9   :  { %v1562_v20 = vadd.f32 %v1825_v4, %v1561_v19 }
 0x3ea   :  { %v1571_v43 = vmax.f32 %v1567_v18, 0.0 }
 0x3eb   :  { %v1570_v21 = vmax.f32 %v1562_v20, 0.0 }
 0x3ed   :  { %2002 = vmatprep.mubr.f32.mxu0 %v1570_v21 }
 0x3ee   :  { %2003 = vmatmul.mubr.f32.vlgmr.msra.gmra.mrb[18].mxu0 %v1571_v43 }
 0x4c1   :  { %v2004_v27 = vpop.f32.mrb[18].mxu0 }
 0x4c2   :  { %v1667_v28 = vadd.f32 %v2004_v27, %v1826_v26  ;;  %v1661_v29 = vpop.f32.mrb[19].mxu0 }
 0x4c3   :  { %v1662_v30 = vadd.f32 %v1826_v26, %v1661_v29 }
 0x4c4   :  { %v1671_v32 = vmax.f32 %v1667_v28, 0.0 }
 0x4c5   :  { %v1670_v31 = vmax.f32 %v1662_v30, 0.0 }
 0x4c7   :  { %2037 = vmatprep.mubr.f32.mxu1 %v1670_v31 }
 0x4c8   :  { %2038 = vmatmul.mubr.f32.vlgmr.msra.gmra.mrb[22].mxu1 %v1671_v32 }
 0x59b   :  { %v2039_v34 = vpop.f32.mrb[22].mxu1 }
 0x59c   :  { %v1767_v35 = vadd.f32 %v2039_v34, %v1827_v33  ;;  %v1761_v36 = vpop.f32.mrb[23].mxu1 }
 0x59d   :  { %v1762_v38 = vadd.f32 %v1827_v33, %v1761_v36 }
 0x59e   :  { %v1771_v39 = vsub.f32 0.0, %v1767_v35 }
 0x59f   :  { %v1770_v23 = vsub.f32 0.0, %v1762_v38 }
 0x5a0   :  { %v1774_v13 = vmul.f32 1.442695, %v1771_v39 }
 0x5a1   :  { %v1772_v41 = vmul.f32 1.442695, %v1770_v23 }
 0x5a2   :  { %2540 = vpow2.f32 %v1774_v13 }
 0x5a3   :  { %2542 = vpow2.f32 %v1772_v41 }
 0x5ac   :  { %v2541_v17 = vpop.eup %2540 }
 0x5ad   :  { %v2543_v45 = vpop.eup %2542  ;;  %v1777_v48 = vadd.f32 1.0, %v2541_v17 }
 0x5ae   :  { %v1776_v49 = vadd.f32 1.0, %v2543_v45 }
 0x5af   :  { %2544 = vrcp.f32 %v1777_v48 }
 0x5b0   :  { %2546 = vrcp.f32 %v1776_v49 }
 0x5b9   :  { %v2545_v44 = vpop.eup %2544 }
 0x5ba   :  { %v2547_v50 = vpop.eup %2546  ;;  %1783 = vst [vmem:[#allocation14 + $0x8] sm:$0xff] %v2545_v44 }
 0x5bb   :  { %1782 = vst [vmem:[#allocation14] sm:$0xff] %v2547_v50 }
 0x5bc   :  { %2713 = shalt.err (!%p2710_p4)
}
 0x5bd   :  { %s2714_s15 = scalar_lea.hbm %s3086_s11, 256 }
 0x5be   :  { %p2715_p5 = scmp.ne.s32.totalorder %s3086_s11, %s2714_s15  ;;  %p2718_p6 = scmp.lt.u32.totalorder %s2714_s15, %s3086_s11 }
 0x5c0   :  { %p2720_p7 = pnand %p2718_p6, %p2715_p5 }
 0x5c2   :  { %2723 = shalt.err (!%p2720_p7)
}
 0x5c3   :  { %1795 = dma.vmem_to_hbm [thread:$0]  %s1790_s14, 256, %s3086_s11, [#allocation4], %s2740_s27, %s2740_s27, %s2741_s28  }
 0x5c4   :  { %2732 = dma.done.wait [#allocation4], 256  }
 0x5c5   :  { %2733 = vsyncadd [#allocation4], 4294967040 }
 0x5c6   :  { %1799 = vsyncpa [#allocation3], 1 }
 0x5c7   :  { %1800 = vsyncpa [#allocation6], 1 }
 0x5c8   :  { %1801 = vsyncpa [#allocation9], 1 }
 0x5c9   :  { %1802 = vsyncpa [#allocation12], 1 }
 0x5ca   :  { %1803 = vsyncpa [#allocation4], 1 }

</bundles_post_ra>
